<compile_context>
chip_gen: v7x
topology: tpu7x:2x2x1
jax: 0.10.0
libtpu: 0.0.40
codegen_flags: <defaults>
</compile_context>

<pallas_src>
from typing import NamedTuple

import jax
import jax.numpy as jnp
from jax.experimental import pallas as pl
from jax.experimental.pallas import tpu as pltpu

BN_EPS = 1e-5
OUT_PAD = 128  # lane-dense packed output width (one full 128-lane tile)


# ------------------------------ fused kernel --------------------------------


def _linear(x, w_ref, b_ref):
    return jnp.dot(x, w_ref[...], preferred_element_type=jnp.float32) + b_ref[...]


def _bn_relu_per_view(h, g_ref, beta_ref, n):
    """PyTorch BatchNorm1d (training mode, biased var, eps=1e-5), per view.

    h is (2N, D) with rows [0:n) = view 1 and rows [n:2n) = view 2.  Per-view
    statistics are computed with a row mask, so the whole thing stays
    elementwise VPU ops + sublane-axis reductions (no reshape / slice /
    relayout inside the kernel).
    """
    m = h.shape[0]
    row = jax.lax.broadcasted_iota(jnp.int32, (m, 1), 0)
    v1 = (row < n).astype(jnp.float32)      # 1.0 for view-1 rows
    v2 = 1.0 - v1                           # 1.0 for view-2 rows
    inv_n = 1.0 / n

    mean1 = jnp.sum(h * v1, axis=0, keepdims=True) * inv_n   # (1, D)
    mean2 = jnp.sum(h * v2, axis=0, keepdims=True) * inv_n   # (1, D)
    mean = v1 * mean1 + v2 * mean2                           # per-row mean
    d = h - mean
    var1 = jnp.sum(d * d * v1, axis=0, keepdims=True) * inv_n
    var2 = jnp.sum(d * d * v2, axis=0, keepdims=True) * inv_n
    var = v1 * var1 + v2 * var2

    hn = d * jax.lax.rsqrt(var + BN_EPS)
    return jnp.maximum(hn * g_ref[...] + beta_ref[...], 0.0)


def _softplus(h):
    # PyTorch F.softplus semantics (threshold=20); min() keeps the untaken
    # branch from overflowing. exp/log1p ride the EUP slot.
    return jnp.where(h > 20.0, h, jnp.log1p(jnp.exp(jnp.minimum(h, 20.0))))


def _fused_simsiam_kernel(
    x1_ref, x2_ref,
    enc_w, enc_b,
    proj_w1, proj_b1, proj_g1, proj_beta1, proj_w2, proj_b2,
    pmu_w1, pmu_b1, pmu_g1, pmu_beta1, pmu_w2, pmu_b2,
    pk_w1, pk_b1, pk_g1, pk_beta1, pk_w2, pk_b2,
    out_ref,
):
    """Single invocation: both views fused into an M = 2N batch.

    HBM traffic is the two f32 flattened image tiles, the weights (fetched
    once) and one lane-dense (2N, 128) packed output tile.  All intermediates
    stay in VMEM/vregs.
    """
    n = x1_ref.shape[0]            # rows per view (static)
    ld = proj_w2.shape[1]          # latent_dim (static)
    m = 2 * n

    # Concatenate the two views along the row axis (VMEM-only), then cast to
    # bf16 in vregs right before the only FLOP-heavy matmul.
    x = jnp.concatenate([x1_ref[...], x2_ref[...]], axis=0).astype(jnp.bfloat16)

    # Encoder (stand-in): Linear -> ReLU.  bf16 MXU operands, f32 accumulation.
    y = jnp.maximum(
        jnp.dot(x, enc_w[...].astype(jnp.bfloat16),
                preferred_element_type=jnp.float32) + enc_b[...],
        0.0,
    )

    # Projector (stand-in): Linear -> BN -> ReLU -> Linear.
    h = _bn_relu_per_view(_linear(y, proj_w1, proj_b1), proj_g1, proj_beta1, n)
    z = _linear(h, proj_w2, proj_b2)

    # Predictor_mu (latent_dim -> latent_dim): fc1 -> BN -> ReLU -> fc2.
    hm = _bn_relu_per_view(_linear(z, pmu_w1, pmu_b1), pmu_g1, pmu_beta1, n)
    mu = _linear(hm, pmu_w2, pmu_b2)

    # Predictor_kappa (feature_dim -> 1): fc1 -> BN -> ReLU, then the 1-column
    # output layer as VPU multiply + lane-sum (no 1-column MXU push), then
    # softplus + 1e-6.
    hk = _bn_relu_per_view(_linear(y, pk_w1, pk_b1), pk_g1, pk_beta1, n)
    kappa_pre = jnp.sum(hk * pk_w2[...], axis=-1, keepdims=True) + pk_b2[...]
    kappa = _softplus(kappa_pre) + 1e-6

    # One unmasked, lane-dense full-width store: [ z | mu | kappa | zero pad ].
    pad = out_ref.shape[-1] - (2 * ld + 1)
    out_ref[...] = jnp.concatenate(
        [z, mu, kappa, jnp.zeros((m, pad), jnp.float32)], axis=-1)


# ------------------------------- parameters ---------------------------------


def _init_linear(key, d_in, d_out):
    kw, kb = jax.random.split(key)
    bound = 1.0 / jnp.sqrt(jnp.float32(d_in))
    w = jax.random.uniform(kw, (d_in, d_out), jnp.float32, -bound, bound)
    b = jax.random.uniform(kb, (1, d_out), jnp.float32, -bound, bound)
    return w, b


def _init_bn(d):
    # gamma=1, beta=0: PyTorch default init.
    return jnp.ones((1, d), jnp.float32), jnp.zeros((1, d), jnp.float32)


def init_simsiam_vi_params(key, in_features, feature_dim, latent_dim):
    ks = jax.random.split(key, 8)
    p = {}
    # Encoder (stand-in): Linear(in_features -> feature_dim) + ReLU
    p["enc_w"], p["enc_b"] = _init_linear(ks[0], in_features, feature_dim)
    # Projector (stand-in): fc1 -> BN -> ReLU -> fc2
    p["proj_w1"], p["proj_b1"] = _init_linear(ks[1], feature_dim, latent_dim)
    p["proj_g1"], p["proj_beta1"] = _init_bn(latent_dim)
    p["proj_w2"], p["proj_b2"] = _init_linear(ks[2], latent_dim, latent_dim)
    # Predictor_mu: Predictor(latent_dim, latent_dim)
    p["pmu_w1"], p["pmu_b1"] = _init_linear(ks[3], latent_dim, latent_dim // 2)
    p["pmu_g1"], p["pmu_beta1"] = _init_bn(latent_dim // 2)
    p["pmu_w2"], p["pmu_b2"] = _init_linear(ks[4], latent_dim // 2, latent_dim)
    # Predictor_kappa: Predictor(feature_dim, 1)
    p["pk_w1"], p["pk_b1"] = _init_linear(ks[5], feature_dim, feature_dim // 2)
    p["pk_g1"], p["pk_beta1"] = _init_bn(feature_dim // 2)
    # fc2 of predictor_kappa stored as a (1, feature_dim//2) row so the kernel
    # can use a VPU multiply + lane-sum instead of a 1-column MXU matmul.
    kw, kb = jax.random.split(ks[6])
    bound = 1.0 / jnp.sqrt(jnp.float32(feature_dim // 2))
    p["pk_w2"] = jax.random.uniform(kw, (1, feature_dim // 2), jnp.float32,
                                    -bound, bound)
    p["pk_b2"] = jax.random.uniform(kb, (1, 1), jnp.float32, -bound, bound)
    return p


_PARAM_ORDER = (
    "enc_w", "enc_b",
    "proj_w1", "proj_b1", "proj_g1", "proj_beta1", "proj_w2", "proj_b2",
    "pmu_w1", "pmu_b1", "pmu_g1", "pmu_beta1", "pmu_w2", "pmu_b2",
    "pk_w1", "pk_b1", "pk_g1", "pk_beta1", "pk_w2", "pk_b2",
)

# Whole-array, VMEM-resident blocks; no grid, so no pipelining / multi-buffering.
_VMEM_SPEC = pl.BlockSpec(memory_space=pltpu.MemorySpace.VMEM)


# ------------------------------ forward pass ---------------------------------


class PowerSphericalParams(NamedTuple):
    loc: jnp.ndarray    # (N, latent_dim)
    scale: jnp.ndarray  # (N, 1)


def simsiam_vi_forward(p, x1, x2):
    n = x1.shape[0]
    latent_dim = p["proj_w2"].shape[1]
    assert 2 * latent_dim + 1 <= OUT_PAD

    # Free contiguous reshapes; the bf16 cast happens inside the kernel so
    # there is no extra wrapper-side HBM pass.
    x1f = x1.reshape(n, -1)
    x2f = x2.reshape(n, -1)

    weights = [p[k] for k in _PARAM_ORDER]

    out = pl.pallas_call(
        _fused_simsiam_kernel,
        out_shape=jax.ShapeDtypeStruct((2 * n, OUT_PAD), jnp.float32),
        in_specs=[_VMEM_SPEC] * (2 + len(weights)),
        out_specs=_VMEM_SPEC,
    )(x1f, x2f, *weights)

    # Cheap XLA glue: unpack the lane-dense slab. Rows [0:n) = view 1.
    ld = latent_dim
    z1, z2 = out[:n, :ld], out[n:, :ld]
    mu1, mu2 = out[:n, ld:2 * ld], out[n:, ld:2 * ld]
    kappa1, kappa2 = out[:n, 2 * ld:2 * ld + 1], out[n:, 2 * ld:2 * ld + 1]

    dist1 = PowerSphericalParams(loc=mu1, scale=kappa1)
    dist2 = PowerSphericalParams(loc=mu2, scale=kappa2)
    return z1, z2, dist1, dist2


# ---------------------------------- main -------------------------------------


if __name__ == "__main__":
    N, C, H, W = 2, 4, 16, 16
    FEATURE_DIM, LATENT_DIM = 32, 16

    key = jax.random.PRNGKey(0)
    k_param, k_x1, k_x2 = jax.random.split(key, 3)

    params = init_simsiam_vi_params(k_param, C * H * W, FEATURE_DIM, LATENT_DIM)
    x1 = jax.random.normal(k_x1, (N, C, H, W), jnp.float32)
    x2 = jax.random.normal(k_x2, (N, C, H, W), jnp.float32)

    z1, z2, dist1, dist2 = jax.jit(simsiam_vi_forward)(params, x1, x2)
    jax.block_until_ready((z1, z2, dist1, dist2))

    assert z1.shape == (N, LATENT_DIM) and z2.shape == (N, LATENT_DIM)
    assert dist1.loc.shape == (N, LATENT_DIM) and dist2.loc.shape == (N, LATENT_DIM)
    assert dist1.scale.shape == (N, 1) and dist2.scale.shape == (N, 1)
    assert bool(jnp.all(jnp.isfinite(z1))) and bool(jnp.all(jnp.isfinite(z2)))
    assert bool(jnp.all(jnp.isfinite(dist1.loc))) and bool(jnp.all(jnp.isfinite(dist2.loc)))
    assert bool(jnp.all(dist1.scale > 0)) and bool(jnp.all(dist2.scale > 0))

    print("KERNEL_OK")
</pallas_src>

<mosaic_0001>
module attributes {stable_mosaic.version = 11 : i64} {
  func.func @_fused_simsiam_kernel(%arg0: memref<2x1024xf32, #tpu.memory_space<vmem>>, %arg1: memref<2x1024xf32, #tpu.memory_space<vmem>>, %arg2: memref<1024x32xf32, #tpu.memory_space<vmem>>, %arg3: memref<1x32xf32, #tpu.memory_space<vmem>>, %arg4: memref<32x16xf32, #tpu.memory_space<vmem>>, %arg5: memref<1x16xf32, #tpu.memory_space<vmem>>, %arg6: memref<1x16xf32, #tpu.memory_space<vmem>>, %arg7: memref<1x16xf32, #tpu.memory_space<vmem>>, %arg8: memref<16x16xf32, #tpu.memory_space<vmem>>, %arg9: memref<1x16xf32, #tpu.memory_space<vmem>>, %arg10: memref<16x8xf32, #tpu.memory_space<vmem>>, %arg11: memref<1x8xf32, #tpu.memory_space<vmem>>, %arg12: memref<1x8xf32, #tpu.memory_space<vmem>>, %arg13: memref<1x8xf32, #tpu.memory_space<vmem>>, %arg14: memref<8x16xf32, #tpu.memory_space<vmem>>, %arg15: memref<1x16xf32, #tpu.memory_space<vmem>>, %arg16: memref<32x16xf32, #tpu.memory_space<vmem>>, %arg17: memref<1x16xf32, #tpu.memory_space<vmem>>, %arg18: memref<1x16xf32, #tpu.memory_space<vmem>>, %arg19: memref<1x16xf32, #tpu.memory_space<vmem>>, %arg20: memref<1x16xf32, #tpu.memory_space<vmem>>, %arg21: memref<1x1xf32, #tpu.memory_space<vmem>>, %arg22: memref<4x128xf32, #tpu.memory_space<vmem>>) attributes {dimension_semantics = [], scalar_prefetch = 0 : i64, scratch_operands = 0 : i64, tpu.core_type = #tpu.core_type<tc>} {
    %c0 = arith.constant 0 : index
    %c0_0 = arith.constant 0 : index
    %0 = vector.load %arg0[%c0, %c0_0] : memref<2x1024xf32, #tpu.memory_space<vmem>>, vector<2x1024xf32>
    %c0_1 = arith.constant 0 : index
    %c0_2 = arith.constant 0 : index
    %1 = vector.load %arg1[%c0_1, %c0_2] : memref<2x1024xf32, #tpu.memory_space<vmem>>, vector<2x1024xf32>
    %2 = tpu.concatenate %0, %1 in 0 : vector<2x1024xf32>, vector<2x1024xf32> -> vector<4x1024xf32>
    %3 = arith.truncf %2 : vector<4x1024xf32> to vector<4x1024xbf16>
    %c0_3 = arith.constant 0 : index
    %c0_4 = arith.constant 0 : index
    %4 = vector.load %arg2[%c0_3, %c0_4] : memref<1024x32xf32, #tpu.memory_space<vmem>>, vector<1024x32xf32>
    %5 = arith.truncf %4 : vector<1024x32xf32> to vector<1024x32xbf16>
    %cst = arith.constant dense<0.000000e+00> : vector<4x32xf32>
    %6 = tpu.matmul %3, %5, %cst {dimension_numbers = #tpu.dot_dimension_numbers<[1], [0], [0], [1], [0, 0, 1, 1], [], []>} : vector<4x1024xbf16>, vector<1024x32xbf16>, vector<4x32xf32> -> vector<4x32xf32>
    %c0_5 = arith.constant 0 : index
    %c0_6 = arith.constant 0 : index
    %7 = vector.load %arg3[%c0_5, %c0_6] : memref<1x32xf32, #tpu.memory_space<vmem>>, vector<1x32xf32>
    %8 = vector.broadcast %7 : vector<1x32xf32> to vector<4x32xf32>
    %9 = arith.addf %6, %8 : vector<4x32xf32>
    %cst_7 = arith.constant 0.000000e+00 : f32
    %10 = vector.broadcast %cst_7 : f32 to vector<4x32xf32>
    %11 = arith.maximumf %9, %10 : vector<4x32xf32>
    %c0_8 = arith.constant 0 : index
    %c0_9 = arith.constant 0 : index
    %12 = vector.load %arg4[%c0_8, %c0_9] : memref<32x16xf32, #tpu.memory_space<vmem>>, vector<32x16xf32>
    %cst_10 = arith.constant dense<0.000000e+00> : vector<4x16xf32>
    %13 = tpu.matmul %11, %12, %cst_10 {dimension_numbers = #tpu.dot_dimension_numbers<[1], [0], [0], [1], [0, 0, 1, 1], [], []>} : vector<4x32xf32>, vector<32x16xf32>, vector<4x16xf32> -> vector<4x16xf32>
    %c0_11 = arith.constant 0 : index
    %c0_12 = arith.constant 0 : index
    %14 = vector.load %arg5[%c0_11, %c0_12] : memref<1x16xf32, #tpu.memory_space<vmem>>, vector<1x16xf32>
    %15 = vector.broadcast %14 : vector<1x16xf32> to vector<4x16xf32>
    %16 = arith.addf %13, %15 : vector<4x16xf32>
    %17 = tpu.iota {dimensions = array<i32: 0>} : vector<4x1xi32>
    %c2_i32 = arith.constant 2 : i32
    %18 = vector.broadcast %c2_i32 : i32 to vector<4x1xi32>
    %19 = arith.cmpi slt, %17, %18 : vector<4x1xi32>
    %20 = arith.extui %19 : vector<4x1xi1> to vector<4x1xi32>
    %21 = arith.sitofp %20 : vector<4x1xi32> to vector<4x1xf32>
    %cst_13 = arith.constant 1.000000e+00 : f32
    %22 = vector.broadcast %cst_13 : f32 to vector<4x1xf32>
    %23 = arith.subf %22, %21 : vector<4x1xf32>
    %24 = vector.broadcast %21 : vector<4x1xf32> to vector<4x16xf32>
    %25 = arith.mulf %16, %24 : vector<4x16xf32>
    %cst_14 = arith.constant dense<0.000000e+00> : vector<16xf32>
    %26 = vector.multi_reduction <add>, %25, %cst_14 [0] : vector<4x16xf32> to vector<16xf32>
    %27 = vector.shape_cast %26 : vector<16xf32> to vector<1x16xf32>
    %cst_15 = arith.constant 5.000000e-01 : f32
    %28 = vector.broadcast %cst_15 : f32 to vector<1x16xf32>
    %29 = arith.mulf %27, %28 : vector<1x16xf32>
    %30 = vector.broadcast %23 : vector<4x1xf32> to vector<4x16xf32>
    %31 = arith.mulf %16, %30 : vector<4x16xf32>
    %cst_16 = arith.constant dense<0.000000e+00> : vector<16xf32>
    %32 = vector.multi_reduction <add>, %31, %cst_16 [0] : vector<4x16xf32> to vector<16xf32>
    %33 = vector.shape_cast %32 : vector<16xf32> to vector<1x16xf32>
    %cst_17 = arith.constant 5.000000e-01 : f32
    %34 = vector.broadcast %cst_17 : f32 to vector<1x16xf32>
    %35 = arith.mulf %33, %34 : vector<1x16xf32>
    %36 = vector.broadcast %21 : vector<4x1xf32> to vector<4x16xf32>
    %37 = vector.broadcast %29 : vector<1x16xf32> to vector<4x16xf32>
    %38 = arith.mulf %36, %37 : vector<4x16xf32>
    %39 = vector.broadcast %23 : vector<4x1xf32> to vector<4x16xf32>
    %40 = vector.broadcast %35 : vector<1x16xf32> to vector<4x16xf32>
    %41 = arith.mulf %39, %40 : vector<4x16xf32>
    %42 = arith.addf %38, %41 : vector<4x16xf32>
    %43 = arith.subf %16, %42 : vector<4x16xf32>
    %44 = arith.mulf %43, %43 : vector<4x16xf32>
    %45 = vector.broadcast %21 : vector<4x1xf32> to vector<4x16xf32>
    %46 = arith.mulf %44, %45 : vector<4x16xf32>
    %cst_18 = arith.constant dense<0.000000e+00> : vector<16xf32>
    %47 = vector.multi_reduction <add>, %46, %cst_18 [0] : vector<4x16xf32> to vector<16xf32>
    %48 = vector.shape_cast %47 : vector<16xf32> to vector<1x16xf32>
    %cst_19 = arith.constant 5.000000e-01 : f32
    %49 = vector.broadcast %cst_19 : f32 to vector<1x16xf32>
    %50 = arith.mulf %48, %49 : vector<1x16xf32>
    %51 = arith.mulf %43, %43 : vector<4x16xf32>
    %52 = vector.broadcast %23 : vector<4x1xf32> to vector<4x16xf32>
    %53 = arith.mulf %51, %52 : vector<4x16xf32>
    %cst_20 = arith.constant dense<0.000000e+00> : vector<16xf32>
    %54 = vector.multi_reduction <add>, %53, %cst_20 [0] : vector<4x16xf32> to vector<16xf32>
    %55 = vector.shape_cast %54 : vector<16xf32> to vector<1x16xf32>
    %cst_21 = arith.constant 5.000000e-01 : f32
    %56 = vector.broadcast %cst_21 : f32 to vector<1x16xf32>
    %57 = arith.mulf %55, %56 : vector<1x16xf32>
    %58 = vector.broadcast %21 : vector<4x1xf32> to vector<4x16xf32>
    %59 = vector.broadcast %50 : vector<1x16xf32> to vector<4x16xf32>
    %60 = arith.mulf %58, %59 : vector<4x16xf32>
    %61 = vector.broadcast %23 : vector<4x1xf32> to vector<4x16xf32>
    %62 = vector.broadcast %57 : vector<1x16xf32> to vector<4x16xf32>
    %63 = arith.mulf %61, %62 : vector<4x16xf32>
    %64 = arith.addf %60, %63 : vector<4x16xf32>
    %cst_22 = arith.constant 9.99999974E-6 : f32
    %65 = vector.broadcast %cst_22 : f32 to vector<4x16xf32>
    %66 = arith.addf %64, %65 : vector<4x16xf32>
    %67 = math.rsqrt %66 : vector<4x16xf32>
    %68 = arith.mulf %43, %67 : vector<4x16xf32>
    %c0_23 = arith.constant 0 : index
    %c0_24 = arith.constant 0 : index
    %69 = vector.load %arg6[%c0_23, %c0_24] : memref<1x16xf32, #tpu.memory_space<vmem>>, vector<1x16xf32>
    %70 = vector.broadcast %69 : vector<1x16xf32> to vector<4x16xf32>
    %71 = arith.mulf %68, %70 : vector<4x16xf32>
    %c0_25 = arith.constant 0 : index
    %c0_26 = arith.constant 0 : index
    %72 = vector.load %arg7[%c0_25, %c0_26] : memref<1x16xf32, #tpu.memory_space<vmem>>, vector<1x16xf32>
    %73 = vector.broadcast %72 : vector<1x16xf32> to vector<4x16xf32>
    %74 = arith.addf %71, %73 : vector<4x16xf32>
    %cst_27 = arith.constant 0.000000e+00 : f32
    %75 = vector.broadcast %cst_27 : f32 to vector<4x16xf32>
    %76 = arith.maximumf %74, %75 : vector<4x16xf32>
    %c0_28 = arith.constant 0 : index
    %c0_29 = arith.constant 0 : index
    %77 = vector.load %arg8[%c0_28, %c0_29] : memref<16x16xf32, #tpu.memory_space<vmem>>, vector<16x16xf32>
    %cst_30 = arith.constant dense<0.000000e+00> : vector<4x16xf32>
    %78 = tpu.matmul %76, %77, %cst_30 {dimension_numbers = #tpu.dot_dimension_numbers<[1], [0], [0], [1], [0, 0, 1, 1], [], []>} : vector<4x16xf32>, vector<16x16xf32>, vector<4x16xf32> -> vector<4x16xf32>
    %c0_31 = arith.constant 0 : index
    %c0_32 = arith.constant 0 : index
    %79 = vector.load %arg9[%c0_31, %c0_32] : memref<1x16xf32, #tpu.memory_space<vmem>>, vector<1x16xf32>
    %80 = vector.broadcast %79 : vector<1x16xf32> to vector<4x16xf32>
    %81 = arith.addf %78, %80 : vector<4x16xf32>
    %c0_33 = arith.constant 0 : index
    %c0_34 = arith.constant 0 : index
    %82 = vector.load %arg10[%c0_33, %c0_34] : memref<16x8xf32, #tpu.memory_space<vmem>>, vector<16x8xf32>
    %cst_35 = arith.constant dense<0.000000e+00> : vector<4x8xf32>
    %83 = tpu.matmul %81, %82, %cst_35 {dimension_numbers = #tpu.dot_dimension_numbers<[1], [0], [0], [1], [0, 0, 1, 1], [], []>} : vector<4x16xf32>, vector<16x8xf32>, vector<4x8xf32> -> vector<4x8xf32>
    %c0_36 = arith.constant 0 : index
    %c0_37 = arith.constant 0 : index
    %84 = vector.load %arg11[%c0_36, %c0_37] : memref<1x8xf32, #tpu.memory_space<vmem>>, vector<1x8xf32>
    %85 = vector.broadcast %84 : vector<1x8xf32> to vector<4x8xf32>
    %86 = arith.addf %83, %85 : vector<4x8xf32>
    %87 = tpu.iota {dimensions = array<i32: 0>} : vector<4x1xi32>
    %c2_i32_38 = arith.constant 2 : i32
    %88 = vector.broadcast %c2_i32_38 : i32 to vector<4x1xi32>
    %89 = arith.cmpi slt, %87, %88 : vector<4x1xi32>
    %90 = arith.extui %89 : vector<4x1xi1> to vector<4x1xi32>
    %91 = arith.sitofp %90 : vector<4x1xi32> to vector<4x1xf32>
    %cst_39 = arith.constant 1.000000e+00 : f32
    %92 = vector.broadcast %cst_39 : f32 to vector<4x1xf32>
    %93 = arith.subf %92, %91 : vector<4x1xf32>
    %94 = vector.broadcast %91 : vector<4x1xf32> to vector<4x8xf32>
    %95 = arith.mulf %86, %94 : vector<4x8xf32>
    %cst_40 = arith.constant dense<0.000000e+00> : vector<8xf32>
    %96 = vector.multi_reduction <add>, %95, %cst_40 [0] : vector<4x8xf32> to vector<8xf32>
    %97 = vector.shape_cast %96 : vector<8xf32> to vector<1x8xf32>
    %cst_41 = arith.constant 5.000000e-01 : f32
    %98 = vector.broadcast %cst_41 : f32 to vector<1x8xf32>
    %99 = arith.mulf %97, %98 : vector<1x8xf32>
    %100 = vector.broadcast %93 : vector<4x1xf32> to vector<4x8xf32>
    %101 = arith.mulf %86, %100 : vector<4x8xf32>
    %cst_42 = arith.constant dense<0.000000e+00> : vector<8xf32>
    %102 = vector.multi_reduction <add>, %101, %cst_42 [0] : vector<4x8xf32> to vector<8xf32>
    %103 = vector.shape_cast %102 : vector<8xf32> to vector<1x8xf32>
    %cst_43 = arith.constant 5.000000e-01 : f32
    %104 = vector.broadcast %cst_43 : f32 to vector<1x8xf32>
    %105 = arith.mulf %103, %104 : vector<1x8xf32>
    %106 = vector.broadcast %91 : vector<4x1xf32> to vector<4x8xf32>
    %107 = vector.broadcast %99 : vector<1x8xf32> to vector<4x8xf32>
    %108 = arith.mulf %106, %107 : vector<4x8xf32>
    %109 = vector.broadcast %93 : vector<4x1xf32> to vector<4x8xf32>
    %110 = vector.broadcast %105 : vector<1x8xf32> to vector<4x8xf32>
    %111 = arith.mulf %109, %110 : vector<4x8xf32>
    %112 = arith.addf %108, %111 : vector<4x8xf32>
    %113 = arith.subf %86, %112 : vector<4x8xf32>
    %114 = arith.mulf %113, %113 : vector<4x8xf32>
    %115 = vector.broadcast %91 : vector<4x1xf32> to vector<4x8xf32>
    %116 = arith.mulf %114, %115 : vector<4x8xf32>
    %cst_44 = arith.constant dense<0.000000e+00> : vector<8xf32>
    %117 = vector.multi_reduction <add>, %116, %cst_44 [0] : vector<4x8xf32> to vector<8xf32>
    %118 = vector.shape_cast %117 : vector<8xf32> to vector<1x8xf32>
    %cst_45 = arith.constant 5.000000e-01 : f32
    %119 = vector.broadcast %cst_45 : f32 to vector<1x8xf32>
    %120 = arith.mulf %118, %119 : vector<1x8xf32>
    %121 = arith.mulf %113, %113 : vector<4x8xf32>
    %122 = vector.broadcast %93 : vector<4x1xf32> to vector<4x8xf32>
    %123 = arith.mulf %121, %122 : vector<4x8xf32>
    %cst_46 = arith.constant dense<0.000000e+00> : vector<8xf32>
    %124 = vector.multi_reduction <add>, %123, %cst_46 [0] : vector<4x8xf32> to vector<8xf32>
    %125 = vector.shape_cast %124 : vector<8xf32> to vector<1x8xf32>
    %cst_47 = arith.constant 5.000000e-01 : f32
    %126 = vector.broadcast %cst_47 : f32 to vector<1x8xf32>
    %127 = arith.mulf %125, %126 : vector<1x8xf32>
    %128 = vector.broadcast %91 : vector<4x1xf32> to vector<4x8xf32>
    %129 = vector.broadcast %120 : vector<1x8xf32> to vector<4x8xf32>
    %130 = arith.mulf %128, %129 : vector<4x8xf32>
    %131 = vector.broadcast %93 : vector<4x1xf32> to vector<4x8xf32>
    %132 = vector.broadcast %127 : vector<1x8xf32> to vector<4x8xf32>
    %133 = arith.mulf %131, %132 : vector<4x8xf32>
    %134 = arith.addf %130, %133 : vector<4x8xf32>
    %cst_48 = arith.constant 9.99999974E-6 : f32
    %135 = vector.broadcast %cst_48 : f32 to vector<4x8xf32>
    %136 = arith.addf %134, %135 : vector<4x8xf32>
    %137 = math.rsqrt %136 : vector<4x8xf32>
    %138 = arith.mulf %113, %137 : vector<4x8xf32>
    %c0_49 = arith.constant 0 : index
    %c0_50 = arith.constant 0 : index
    %139 = vector.load %arg12[%c0_49, %c0_50] : memref<1x8xf32, #tpu.memory_space<vmem>>, vector<1x8xf32>
    %140 = vector.broadcast %139 : vector<1x8xf32> to vector<4x8xf32>
    %141 = arith.mulf %138, %140 : vector<4x8xf32>
    %c0_51 = arith.constant 0 : index
    %c0_52 = arith.constant 0 : index
    %142 = vector.load %arg13[%c0_51, %c0_52] : memref<1x8xf32, #tpu.memory_space<vmem>>, vector<1x8xf32>
    %143 = vector.broadcast %142 : vector<1x8xf32> to vector<4x8xf32>
    %144 = arith.addf %141, %143 : vector<4x8xf32>
    %cst_53 = arith.constant 0.000000e+00 : f32
    %145 = vector.broadcast %cst_53 : f32 to vector<4x8xf32>
    %146 = arith.maximumf %144, %145 : vector<4x8xf32>
    %c0_54 = arith.constant 0 : index
    %c0_55 = arith.constant 0 : index
    %147 = vector.load %arg14[%c0_54, %c0_55] : memref<8x16xf32, #tpu.memory_space<vmem>>, vector<8x16xf32>
    %cst_56 = arith.constant dense<0.000000e+00> : vector<4x16xf32>
    %148 = tpu.matmul %146, %147, %cst_56 {dimension_numbers = #tpu.dot_dimension_numbers<[1], [0], [0], [1], [0, 0, 1, 1], [], []>} : vector<4x8xf32>, vector<8x16xf32>, vector<4x16xf32> -> vector<4x16xf32>
    %c0_57 = arith.constant 0 : index
    %c0_58 = arith.constant 0 : index
    %149 = vector.load %arg15[%c0_57, %c0_58] : memref<1x16xf32, #tpu.memory_space<vmem>>, vector<1x16xf32>
    %150 = vector.broadcast %149 : vector<1x16xf32> to vector<4x16xf32>
    %151 = arith.addf %148, %150 : vector<4x16xf32>
    %c0_59 = arith.constant 0 : index
    %c0_60 = arith.constant 0 : index
    %152 = vector.load %arg16[%c0_59, %c0_60] : memref<32x16xf32, #tpu.memory_space<vmem>>, vector<32x16xf32>
    %cst_61 = arith.constant dense<0.000000e+00> : vector<4x16xf32>
    %153 = tpu.matmul %11, %152, %cst_61 {dimension_numbers = #tpu.dot_dimension_numbers<[1], [0], [0], [1], [0, 0, 1, 1], [], []>} : vector<4x32xf32>, vector<32x16xf32>, vector<4x16xf32> -> vector<4x16xf32>
    %c0_62 = arith.constant 0 : index
    %c0_63 = arith.constant 0 : index
    %154 = vector.load %arg17[%c0_62, %c0_63] : memref<1x16xf32, #tpu.memory_space<vmem>>, vector<1x16xf32>
    %155 = vector.broadcast %154 : vector<1x16xf32> to vector<4x16xf32>
    %156 = arith.addf %153, %155 : vector<4x16xf32>
    %157 = tpu.iota {dimensions = array<i32: 0>} : vector<4x1xi32>
    %c2_i32_64 = arith.constant 2 : i32
    %158 = vector.broadcast %c2_i32_64 : i32 to vector<4x1xi32>
    %159 = arith.cmpi slt, %157, %158 : vector<4x1xi32>
    %160 = arith.extui %159 : vector<4x1xi1> to vector<4x1xi32>
    %161 = arith.sitofp %160 : vector<4x1xi32> to vector<4x1xf32>
    %cst_65 = arith.constant 1.000000e+00 : f32
    %162 = vector.broadcast %cst_65 : f32 to vector<4x1xf32>
    %163 = arith.subf %162, %161 : vector<4x1xf32>
    %164 = vector.broadcast %161 : vector<4x1xf32> to vector<4x16xf32>
    %165 = arith.mulf %156, %164 : vector<4x16xf32>
    %cst_66 = arith.constant dense<0.000000e+00> : vector<16xf32>
    %166 = vector.multi_reduction <add>, %165, %cst_66 [0] : vector<4x16xf32> to vector<16xf32>
    %167 = vector.shape_cast %166 : vector<16xf32> to vector<1x16xf32>
    %cst_67 = arith.constant 5.000000e-01 : f32
    %168 = vector.broadcast %cst_67 : f32 to vector<1x16xf32>
    %169 = arith.mulf %167, %168 : vector<1x16xf32>
    %170 = vector.broadcast %163 : vector<4x1xf32> to vector<4x16xf32>
    %171 = arith.mulf %156, %170 : vector<4x16xf32>
    %cst_68 = arith.constant dense<0.000000e+00> : vector<16xf32>
    %172 = vector.multi_reduction <add>, %171, %cst_68 [0] : vector<4x16xf32> to vector<16xf32>
    %173 = vector.shape_cast %172 : vector<16xf32> to vector<1x16xf32>
    %cst_69 = arith.constant 5.000000e-01 : f32
    %174 = vector.broadcast %cst_69 : f32 to vector<1x16xf32>
    %175 = arith.mulf %173, %174 : vector<1x16xf32>
    %176 = vector.broadcast %161 : vector<4x1xf32> to vector<4x16xf32>
    %177 = vector.broadcast %169 : vector<1x16xf32> to vector<4x16xf32>
    %178 = arith.mulf %176, %177 : vector<4x16xf32>
    %179 = vector.broadcast %163 : vector<4x1xf32> to vector<4x16xf32>
    %180 = vector.broadcast %175 : vector<1x16xf32> to vector<4x16xf32>
    %181 = arith.mulf %179, %180 : vector<4x16xf32>
    %182 = arith.addf %178, %181 : vector<4x16xf32>
    %183 = arith.subf %156, %182 : vector<4x16xf32>
    %184 = arith.mulf %183, %183 : vector<4x16xf32>
    %185 = vector.broadcast %161 : vector<4x1xf32> to vector<4x16xf32>
    %186 = arith.mulf %184, %185 : vector<4x16xf32>
    %cst_70 = arith.constant dense<0.000000e+00> : vector<16xf32>
    %187 = vector.multi_reduction <add>, %186, %cst_70 [0] : vector<4x16xf32> to vector<16xf32>
    %188 = vector.shape_cast %187 : vector<16xf32> to vector<1x16xf32>
    %cst_71 = arith.constant 5.000000e-01 : f32
    %189 = vector.broadcast %cst_71 : f32 to vector<1x16xf32>
    %190 = arith.mulf %188, %189 : vector<1x16xf32>
    %191 = arith.mulf %183, %183 : vector<4x16xf32>
    %192 = vector.broadcast %163 : vector<4x1xf32> to vector<4x16xf32>
    %193 = arith.mulf %191, %192 : vector<4x16xf32>
    %cst_72 = arith.constant dense<0.000000e+00> : vector<16xf32>
    %194 = vector.multi_reduction <add>, %193, %cst_72 [0] : vector<4x16xf32> to vector<16xf32>
    %195 = vector.shape_cast %194 : vector<16xf32> to vector<1x16xf32>
    %cst_73 = arith.constant 5.000000e-01 : f32
    %196 = vector.broadcast %cst_73 : f32 to vector<1x16xf32>
    %197 = arith.mulf %195, %196 : vector<1x16xf32>
    %198 = vector.broadcast %161 : vector<4x1xf32> to vector<4x16xf32>
    %199 = vector.broadcast %190 : vector<1x16xf32> to vector<4x16xf32>
    %200 = arith.mulf %198, %199 : vector<4x16xf32>
    %201 = vector.broadcast %163 : vector<4x1xf32> to vector<4x16xf32>
    %202 = vector.broadcast %197 : vector<1x16xf32> to vector<4x16xf32>
    %203 = arith.mulf %201, %202 : vector<4x16xf32>
    %204 = arith.addf %200, %203 : vector<4x16xf32>
    %cst_74 = arith.constant 9.99999974E-6 : f32
    %205 = vector.broadcast %cst_74 : f32 to vector<4x16xf32>
    %206 = arith.addf %204, %205 : vector<4x16xf32>
    %207 = math.rsqrt %206 : vector<4x16xf32>
    %208 = arith.mulf %183, %207 : vector<4x16xf32>
    %c0_75 = arith.constant 0 : index
    %c0_76 = arith.constant 0 : index
    %209 = vector.load %arg18[%c0_75, %c0_76] : memref<1x16xf32, #tpu.memory_space<vmem>>, vector<1x16xf32>
    %210 = vector.broadcast %209 : vector<1x16xf32> to vector<4x16xf32>
    %211 = arith.mulf %208, %210 : vector<4x16xf32>
    %c0_77 = arith.constant 0 : index
    %c0_78 = arith.constant 0 : index
    %212 = vector.load %arg19[%c0_77, %c0_78] : memref<1x16xf32, #tpu.memory_space<vmem>>, vector<1x16xf32>
    %213 = vector.broadcast %212 : vector<1x16xf32> to vector<4x16xf32>
    %214 = arith.addf %211, %213 : vector<4x16xf32>
    %cst_79 = arith.constant 0.000000e+00 : f32
    %215 = vector.broadcast %cst_79 : f32 to vector<4x16xf32>
    %216 = arith.maximumf %214, %215 : vector<4x16xf32>
    %c0_80 = arith.constant 0 : index
    %c0_81 = arith.constant 0 : index
    %217 = vector.load %arg20[%c0_80, %c0_81] : memref<1x16xf32, #tpu.memory_space<vmem>>, vector<1x16xf32>
    %218 = vector.broadcast %217 : vector<1x16xf32> to vector<4x16xf32>
    %219 = arith.mulf %216, %218 : vector<4x16xf32>
    %cst_82 = arith.constant dense<0.000000e+00> : vector<4xf32>
    %220 = vector.multi_reduction <add>, %219, %cst_82 [1] : vector<4x16xf32> to vector<4xf32>
    %221 = vector.shape_cast %220 : vector<4xf32> to vector<4x1xf32>
    %c0_83 = arith.constant 0 : index
    %c0_84 = arith.constant 0 : index
    %222 = vector.load %arg21[%c0_83, %c0_84] : memref<1x1xf32, #tpu.memory_space<vmem>>, vector<1x1xf32>
    %223 = vector.broadcast %222 : vector<1x1xf32> to vector<4x1xf32>
    %224 = arith.addf %221, %223 : vector<4x1xf32>
    %cst_85 = arith.constant 2.000000e+01 : f32
    %225 = vector.broadcast %cst_85 : f32 to vector<4x1xf32>
    %226 = arith.cmpf ogt, %224, %225 : vector<4x1xf32>
    %cst_86 = arith.constant 2.000000e+01 : f32
    %227 = vector.broadcast %cst_86 : f32 to vector<4x1xf32>
    %228 = arith.minimumf %224, %227 : vector<4x1xf32>
    %229 = math.exp %228 : vector<4x1xf32>
    %230 = math.log1p %229 : vector<4x1xf32>
    %231 = arith.select %226, %224, %230 : vector<4x1xi1>, vector<4x1xf32>
    %cst_87 = arith.constant 9.99999997E-7 : f32
    %232 = vector.broadcast %cst_87 : f32 to vector<4x1xf32>
    %233 = arith.addf %231, %232 : vector<4x1xf32>
    %cst_88 = arith.constant 0.000000e+00 : f32
    %234 = vector.broadcast %cst_88 : f32 to vector<4x95xf32>
    %235 = tpu.concatenate %81, %151, %233, %234 in 1 : vector<4x16xf32>, vector<4x16xf32>, vector<4x1xf32>, vector<4x95xf32> -> vector<4x128xf32>
    %c0_89 = arith.constant 0 : index
    %c0_90 = arith.constant 0 : index
    %236 = vector.load %arg22[%c0_89, %c0_90] : memref<4x128xf32, #tpu.memory_space<vmem>>, vector<4x128xf32>
    tpu.vector_store %arg22[%c0_89, %c0_90], %235 {strides = array<i32>} : memref<4x128xf32, #tpu.memory_space<vmem>>, vector<4x128xf32>,
    return
  }
}

</mosaic_0001>

<bundles_post_ra>
// kernel: simsiam_vi_forward.1
= control target key start
LH: loop header
LB: loop body
LE: loop exit
PB: predicated region body
PF: predicated region fallthrough
CT: control target
= control target key end

     0   :  { %v1412_v47 = vmov 1983009808   ;;  %v84_v49 = vlaneseq  ;;  %vm166_vm0 = vcmask 1041408   ;;  %vm1414_vm1 = vmmov 0   ;;  %s2132_s2 = inlined_call_operand.vmem [shape: f32[1024,32], index: 2, kind: input, shape index: {}]   ;;  %s2133_s0 = inlined_call_operand.vmem [shape: f32[2,1024], index: 0, kind: input, shape index: {}]   ;;  %s2134_s1 = inlined_call_operand.vmem [shape: f32[2,1024], index: 1, kind: input, shape index: {}]   ;;  %s2135_s4 = inlined_call_operand.vmem [shape: f32[32,16], index: 4, kind: input, shape index: {}]   ;;  %s2136_s3 = inlined_call_operand.vmem [shape: f32[1,32], index: 3, kind: input, shape index: {}]   ;;  %s2137_s8 = inlined_call_operand.vmem [shape: f32[16,16], index: 8, kind: input, shape index: {}]   ;;  %s2138_s10 = inlined_call_operand.vmem [shape: f32[16,8], index: 10, kind: input, shape index: {}]   ;;  %s2139_s5 = inlined_call_operand.vmem [shape: f32[1,16], index: 5, kind: input, shape index: {}]   ;;  %s2140_s6 = inlined_call_operand.vmem [shape: f32[1,16], index: 6, kind: input, shape index: {}]   ;;  %s2141_s7 = inlined_call_operand.vmem [shape: f32[1,16], index: 7, kind: input, shape index: {}]   ;;  %s2142_s16 = inlined_call_operand.vmem [shape: f32[32,16], index: 16, kind: input, shape index: {}]   ;;  %s2143_s9 = inlined_call_operand.vmem [shape: f32[1,16], index: 9, kind: input, shape index: {}]   ;;  %s2144_s14 = inlined_call_operand.vmem [shape: f32[8,16], index: 14, kind: input, shape index: {}]   ;;  %s2145_s21 = inlined_call_operand.<no memory space> [shape: f32[1,1], index: 21, kind: input, shape index: {}]   ;;  %s2146_s11 = inlined_call_operand.vmem [shape: f32[1,8], index: 11, kind: input, shape index: {}]   ;;  %s2147_s17 = inlined_call_operand.vmem [shape: f32[1,16], index: 17, kind: input, shape index: {}]   ;;  %s2148_s12 = inlined_call_operand.vmem [shape: f32[1,8], index: 12, kind: input, shape index: {}]   ;;  %s2149_s13 = inlined_call_operand.vmem [shape: f32[1,8], index: 13, kind: input, shape index: {}]   ;;  %s2150_s18 = inlined_call_operand.vmem [shape: f32[1,16], index: 18, kind: input, shape index: {}]   ;;  %s2151_s19 = inlined_call_operand.vmem [shape: f32[1,16], index: 19, kind: input, shape index: {}]   ;;  %s2152_s20 = inlined_call_operand.vmem [shape: f32[1,16], index: 20, kind: input, shape index: {}]   ;;  %s2153_s15 = inlined_call_operand.vmem [shape: f32[1,16], index: 15, kind: input, shape index: {}]   ;;  %s2154_s22 = inlined_call_operand.vmem [shape: f32[4,128], index: 22, kind: output, shape index: {}]  }
   0x1   :  { %2161 = sst [smem:[#allocation3_spill]] %s2132_s2  ;;  %v82_v48 = vunpack.c.l.s4 %v1412_v47  ;;  %vm554_vm2 = vcmask 261120   ;;  %vm635_vm4 = vcmask 125952   ;;  %vm708_vm5 = vcmask 130048  }
   0x2   :  { %2162 = sst [smem:[#allocation4_spill]] %s2133_s0  ;;  %s2168_s29 = sld [smem:[#allocation3_spill]]  ;;  %vm865_vm6 = vcmask 60416   ;;  %vm937_vm7 = vcmask 64512   ;;  %vm1200_vm10 = vcmask 269312  }
   0x3   :  { %2163 = sst [smem:[#allocation5_spill]] %s2134_s1  ;;  %v83_v63 = vunpack.c.0.s8 %v82_v48  ;;  %s2169_s0 = sld [smem:[#allocation4_spill]] }
   0x4   :  { %2164 = sst [smem:[#allocation6_spill]] %s2135_s4  ;;  %s2170_s26 = sld [smem:[#allocation5_spill]] }
   0x5   :  { %2165 = sst [smem:[#allocation7_spill]] %s2136_s3  ;;  %s2171_s30 = sld [smem:[#allocation6_spill]] }
   0x6   :  { %2166 = sst [smem:[#allocation8_spill]] %s2137_s8 }
   0x7   :  { %2167 = sst [smem:[#allocation9_spill]] %s2138_s10  ;;  %s2173_s4 = sld [smem:[#allocation8_spill]] }
   0x8   :  { %v199_v0 = vld [vmem:[%s2168_s29 + $0x80] sm:$0xff]  ;;  %v200_v1 = vld [vmem:[%s2168_s29 + $0x88] sm:$0xff]  ;;  %v201_v11 = vld [vmem:[%s2168_s29 + $0x90] sm:$0xff]  ;;  %s2174_s3 = sld [smem:[#allocation9_spill]] }
   0x9   :  { %v231_v2 = vld [vmem:[%s2168_s29 + $0x180] sm:$0xff]  ;;  %v319_v3 = vpack.c.bf16 %v200_v1, %v199_v0  ;;  %v232_v4 = vld [vmem:[%s2168_s29 + $0x188] sm:$0xff]  ;;  %v202_v13 = vld [vmem:[%s2168_s29 + $0x98] sm:$0xff]  ;;  %v1659_v0 = vshrl.u32 %v84_v49, 7 }
   0xa   :  { %v183_v5 = vld [vmem:[%s2168_s29] sm:$0xff]  ;;  %v184_v6 = vld [vmem:[%s2168_s29 + $0x8] sm:$0xff]  ;;  %v335_v7 = vpack.c.bf16 %v232_v4, %v231_v2  ;;  %v233_v14 = vld [vmem:[%s2168_s29 + $0x190] sm:$0xff]  ;;  %v320_v16 = vpack.c.bf16 %v202_v13, %v201_v11 }
   0xb   :  { %v311_v8 = vpack.c.bf16 %v184_v6, %v183_v5  ;;  %v215_v9 = vld [vmem:[%s2168_s29 + $0x100] sm:$0xff]  ;;  %v216_v10 = vld [vmem:[%s2168_s29 + $0x108] sm:$0xff]  ;;  %1227 = vmatprep.subr.bf16.mxu0 %v319_v3  ;;  %v234_v15 = vld [vmem:[%s2168_s29 + $0x198] sm:$0xff]  ;;  %v1686_v13 = vsub.s32 %v83_v63, %v1659_v0  ;;  %vm630_vm3 = vcmp.lt.s32.totalorder %v1659_v0, 2 }
   0xc   :  { %v327_v12 = vpack.c.bf16 %v216_v10, %v215_v9  ;;  %1249 = vmatprep.subr.bf16.mxu1 %v335_v7  ;;  %v336_v17 = vpack.c.bf16 %v234_v15, %v233_v14  ;;  %v185_v18 = vld [vmem:[%s2168_s29 + $0x10] sm:$0xff]  ;;  %v186_v19 = vld [vmem:[%s2168_s29 + $0x18] sm:$0xff]  ;;  %v203_v23 = vld [vmem:[%s2168_s29 + $0xa0] sm:$0xff] }
   0xd   :  { %1228 = vmatpush3.bf16.msra.mxu0 %v311_v8  ;;  %v217_v20 = vld [vmem:[%s2168_s29 + $0x110] sm:$0xff]  ;;  %v312_v21 = vpack.c.bf16 %v186_v19, %v185_v18  ;;  %v218_v22 = vld [vmem:[%s2168_s29 + $0x118] sm:$0xff]  ;;  %v204_v24 = vld [vmem:[%s2168_s29 + $0xa8] sm:$0xff] }
   0xe   :  { %1250 = vmatpush3.bf16.msra.mxu1 %v327_v12  ;;  %1229 = vmatprep.subr.bf16.mxu0 %v320_v16  ;;  %v328_v25 = vpack.c.bf16 %v218_v22, %v217_v20  ;;  %v321_v26 = vpack.c.bf16 %v204_v24, %v203_v23  ;;  %v235_v27 = vld [vmem:[%s2168_s29 + $0x1a0] sm:$0xff]  ;;  %v236_v28 = vld [vmem:[%s2168_s29 + $0x1a8] sm:$0xff]  ;;  %v205_v35 = vld [vmem:[%s2168_s29 + $0xb0] sm:$0xff] }
   0xf   :  { %1251 = vmatprep.subr.bf16.mxu1 %v336_v17  ;;  %v187_v29 = vld [vmem:[%s2168_s29 + $0x20] sm:$0xff]  ;;  %v337_v30 = vpack.c.bf16 %v236_v28, %v235_v27  ;;  %v188_v31 = vld [vmem:[%s2168_s29 + $0x28] sm:$0xff]  ;;  %v206_v36 = vld [vmem:[%s2168_s29 + $0xb8] sm:$0xff] }
  0x10   :  { %v219_v32 = vld [vmem:[%s2168_s29 + $0x120] sm:$0xff]  ;;  %v220_v33 = vld [vmem:[%s2168_s29 + $0x128] sm:$0xff]  ;;  %v313_v34 = vpack.c.bf16 %v188_v31, %v187_v29  ;;  %v237_v37 = vld [vmem:[%s2168_s29 + $0x1b0] sm:$0xff]  ;;  %v322_v39 = vpack.c.bf16 %v206_v36, %v205_v35 }
  0x11   :  { %1230 = vmatpush3.bf16.msra.mxu0 %v312_v21  ;;  %v329_v38 = vpack.c.bf16 %v220_v33, %v219_v32  ;;  %v238_v40 = vld [vmem:[%s2168_s29 + $0x1b8] sm:$0xff]  ;;  %v189_v41 = vld [vmem:[%s2168_s29 + $0x30] sm:$0xff]  ;;  %v207_v46 = vld [vmem:[%s2168_s29 + $0xc0] sm:$0xff] }
  0x12   :  { %1252 = vmatpush3.bf16.msra.mxu1 %v328_v25  ;;  %1231 = vmatprep.subr.bf16.mxu0 %v321_v26  ;;  %v190_v42 = vld [vmem:[%s2168_s29 + $0x38] sm:$0xff]  ;;  %v338_v43 = vpack.c.bf16 %v238_v40, %v237_v37  ;;  %v221_v44 = vld [vmem:[%s2168_s29 + $0x130] sm:$0xff]  ;;  %v208_v50 = vld [vmem:[%s2168_s29 + $0xc8] sm:$0xff] }
  0x13   :  { %1253 = vmatprep.subr.bf16.mxu1 %v337_v30  ;;  %v222_v45 = vld [vmem:[%s2168_s29 + $0x138] sm:$0xff]  ;;  %v239_v51 = vld [vmem:[%s2168_s29 + $0x1c0] sm:$0xff]  ;;  %v240_v52 = vld [vmem:[%s2168_s29 + $0x1c8] sm:$0xff]  ;;  %v314_v53 = vpack.c.bf16 %v190_v42, %v189_v41  ;;  %v323_v55 = vpack.c.bf16 %v208_v50, %v207_v46 }
  0x14   :  { %v330_v54 = vpack.c.bf16 %v222_v45, %v221_v44  ;;  %v191_v56 = vld [vmem:[%s2168_s29 + $0x40] sm:$0xff]  ;;  %v192_v57 = vld [vmem:[%s2168_s29 + $0x48] sm:$0xff]  ;;  %v339_v59 = vpack.c.bf16 %v240_v52, %v239_v51  ;;  %v209_v61 = vld [vmem:[%s2168_s29 + $0xd0] sm:$0xff] }
  0x15   :  { %1232 = vmatpush3.bf16.msra.mxu0 %v313_v34  ;;  %v223_v58 = vld [vmem:[%s2168_s29 + $0x140] sm:$0xff]  ;;  %v224_v60 = vld [vmem:[%s2168_s29 + $0x148] sm:$0xff]  ;;  %v210_v62 = vld [vmem:[%s2168_s29 + $0xd8] sm:$0xff]  ;;  %v315_v3 = vpack.c.bf16 %v192_v57, %v191_v56 }
  0x16   :  { %1254 = vmatpush3.bf16.msra.mxu1 %v329_v38  ;;  %1233 = vmatprep.subr.bf16.mxu0 %v322_v39  ;;  %v241_v1 = vld [vmem:[%s2168_s29 + $0x1d0] sm:$0xff]  ;;  %v242_v2 = vld [vmem:[%s2168_s29 + $0x1d8] sm:$0xff]  ;;  %v331_v4 = vpack.c.bf16 %v224_v60, %v223_v58  ;;  %v324_v5 = vpack.c.bf16 %v210_v62, %v209_v61  ;;  %v211_v11 = vld [vmem:[%s2168_s29 + $0xe0] sm:$0xff] }
  0x17   :  { %1255 = vmatprep.subr.bf16.mxu1 %v338_v43  ;;  %v193_v6 = vld [vmem:[%s2168_s29 + $0x50] sm:$0xff]  ;;  %v194_v7 = vld [vmem:[%s2168_s29 + $0x58] sm:$0xff]  ;;  %v340_v9 = vpack.c.bf16 %v242_v2, %v241_v1  ;;  %v212_v12 = vld [vmem:[%s2168_s29 + $0xe8] sm:$0xff] }
  0x18   :  { %v225_v8 = vld [vmem:[%s2168_s29 + $0x150] sm:$0xff]  ;;  %v226_v10 = vld [vmem:[%s2168_s29 + $0x158] sm:$0xff]  ;;  %v243_v14 = vld [vmem:[%s2168_s29 + $0x1e0] sm:$0xff]  ;;  %v316_v17 = vpack.c.bf16 %v194_v7, %v193_v6  ;;  %v325_v22 = vpack.c.bf16 %v212_v12, %v211_v11 }
  0x19   :  { %1234 = vmatpush3.bf16.msra.mxu0 %v314_v53  ;;  %v244_v15 = vld [vmem:[%s2168_s29 + $0x1e8] sm:$0xff]  ;;  %v195_v16 = vld [vmem:[%s2168_s29 + $0x60] sm:$0xff]  ;;  %v332_v21 = vpack.c.bf16 %v226_v10, %v225_v8  ;;  %v213_v23 = vld [vmem:[%s2168_s29 + $0xf0] sm:$0xff] }
  0x1a   :  { %1256 = vmatpush3.bf16.msra.mxu1 %v330_v54  ;;  %1235 = vmatprep.subr.bf16.mxu0 %v323_v55  ;;  %v196_v18 = vld [vmem:[%s2168_s29 + $0x68] sm:$0xff]  ;;  %v227_v19 = vld [vmem:[%s2168_s29 + $0x160] sm:$0xff]  ;;  %v214_v24 = vld [vmem:[%s2168_s29 + $0xf8] sm:$0xff]  ;;  %v341_v26 = vpack.c.bf16 %v244_v15, %v243_v14 }
  0x1b   :  { %1257 = vmatprep.subr.bf16.mxu1 %v339_v59  ;;  %v228_v20 = vld [vmem:[%s2168_s29 + $0x168] sm:$0xff]  ;;  %v74_v25 = vld [vmem:[%s2169_s0] sm:$0xff]  ;;  %v245_v27 = vld [vmem:[%s2168_s29 + $0x1f0] sm:$0xff]  ;;  %v317_v36 = vpack.c.bf16 %v196_v18, %v195_v16  ;;  %v326_v38 = vpack.c.bf16 %v214_v24, %v213_v23 }
  0x1c   :  { %v76_v28 = vld [vmem:[%s2170_s26] sm:$0xff]  ;;  %v87_v29 = vrot.slane %v74_v25, %v1686_v13  ;;  %v80_v30 = vcombine.high %v74_v25, %v74_v25  ;;  %v246_v31 = vld [vmem:[%s2168_s29 + $0x1f8] sm:$0xff]  ;;  %v197_v32 = vld [vmem:[%s2168_s29 + $0x70] sm:$0xff]  ;;  %v333_v37 = vpack.c.bf16 %v228_v20, %v227_v19 }
  0x1d   :  { %1236 = vmatpush3.bf16.msra.mxu0 %v315_v3  ;;  %v75_v33 = vld [vmem:[%s2169_s0 + $0x8] sm:$0xff]  ;;  %v124_v34 = vcombine.low %v76_v28, %v76_v28  ;;  %v138_v35 = vrot.slane %v76_v28, %v1686_v13  ;;  %v198_v39 = vld [vmem:[%s2168_s29 + $0x78] sm:$0xff]  ;;  %v229_v40 = vld [vmem:[%s2168_s29 + $0x170] sm:$0xff]  ;;  %v342_v49 = vpack.c.bf16 %v246_v31, %v245_v27  ;;  %s2172_s0 = sld [smem:[#allocation7_spill]] }
  0x1e   :  { %1258 = vmatpush3.bf16.msra.mxu1 %v331_v4  ;;  %1237 = vmatprep.subr.bf16.mxu0 %v324_v5  ;;  %v77_v41 = vld [vmem:[%s2170_s26 + $0x8] sm:$0xff]  ;;  %v94_v42 = vrot.slane %v80_v30, %v1686_v13  ;;  %v230_v43 = vld [vmem:[%s2168_s29 + $0x178] sm:$0xff]  ;;  %v95_v44 = vcombine.high %v87_v29, %v87_v29  ;;  %v263_v47 = vld [vmem:[%s2168_s29 + $0x280] sm:$0xff]  ;;  %v97_v50 = vcombine.high %v75_v33, %v75_v33 }
  0x1f   :  { %1259 = vmatprep.subr.bf16.mxu1 %v340_v9  ;;  %v131_v45 = vrot.slane %v124_v34, %v1686_v13  ;;  %v140_v46 = vcombine.high %v138_v35, %v138_v35  ;;  %v264_v48 = vld [vmem:[%s2168_s29 + $0x288] sm:$0xff]  ;;  %v295_v54 = vld [vmem:[%s2168_s29 + $0x380] sm:$0xff]  ;;  %v1760_v56 = vrot.slane %v75_v33, %v1686_v13  ;;  %v141_v57 = vcombine.low %v77_v41, %v77_v41  ;;  %v265_v9 = vld [vmem:[%s2168_s29 + $0x290] sm:$0xff] }
  0x20   :  { %v96_v51 = vcombine.high %v94_v42, %v94_v42  ;;  %v296_v55 = vld [vmem:[%s2168_s29 + $0x388] sm:$0xff]  ;;  %v318_v58 = vpack.c.bf16 %v198_v39, %v197_v32  ;;  %v334_v59 = vpack.c.bf16 %v230_v43, %v229_v40  ;;  %v351_v61 = vpack.c.bf16 %v264_v48, %v263_v47  ;;  %v247_v62 = vld [vmem:[%s2168_s29 + $0x200] sm:$0xff]  ;;  %v266_v10 = vld [vmem:[%s2168_s29 + $0x298] sm:$0xff] }
  0x21   :  { %1238 = vmatpush3.bf16.msra.mxu0 %v316_v17  ;;  %v139_v52 = vcombine.high %v131_v45, %v131_v45  ;;  %v167_v53 = vsel %vm166_vm0, %v87_v29, %v131_v45  ;;  %v169_v2 = vsel %vm166_vm0, %v94_v42, %v138_v35  ;;  %v248_v3 = vld [vmem:[%s2168_s29 + $0x208] sm:$0xff]  ;;  %v279_v4 = vld [vmem:[%s2168_s29 + $0x300] sm:$0xff]  ;;  %v367_v8 = vpack.c.bf16 %v296_v55, %v295_v54  ;;  %v297_v11 = vld [vmem:[%s2168_s29 + $0x390] sm:$0xff] }
  0x22   :  { %1260 = vmatpush3.bf16.msra.mxu1 %v332_v21  ;;  %1239 = vmatprep.subr.bf16.mxu0 %v325_v22  ;;  %v170_v60 = vsel %vm166_vm0, %v96_v51, %v140_v46  ;;  %v280_v5 = vld [vmem:[%s2168_s29 + $0x308] sm:$0xff]  ;;  %v175_v7 = vpack.c.bf16 %v167_v53, %v167_v53  ;;  %v298_v12 = vld [vmem:[%s2168_s29 + $0x398] sm:$0xff]  ;;  %v112_v14 = vcombine.high %v1760_v56, %v1760_v56  ;;  %v249_v22 = vld [vmem:[%s2168_s29 + $0x210] sm:$0xff] }
  0x23   :  { %1261 = vmatprep.subr.bf16.mxu1 %v341_v26  ;;  %v168_v63 = vsel %vm166_vm0, %v95_v44, %v139_v52  ;;  %v178_v1 = vpack.c.bf16 %v170_v60, %v170_v60  ;;  %v1792_v15 = vrot.slane %v141_v57, %v1686_v13  ;;  %v1795_v16 = vrot.slane %v97_v50, %v1686_v13  ;;  %v250_v23 = vld [vmem:[%s2168_s29 + $0x218] sm:$0xff]  ;;  %v267_v28 = vld [vmem:[%s2168_s29 + $0x2a0] sm:$0xff]  ;;  %v268_v29 = vld [vmem:[%s2168_s29 + $0x2a8] sm:$0xff] }
  0x24   :  { %v176_v6 = vpack.c.bf16 %v168_v63, %v168_v63  ;;  %v1798_v17 = vrot.slane %v77_v41, %v1686_v13  ;;  %v177_v18 = vpack.c.bf16 %v169_v2, %v169_v2  ;;  %v343_v19 = vpack.c.bf16 %v248_v3, %v247_v62  ;;  %v281_v13 = vld [vmem:[%s2168_s29 + $0x310] sm:$0xff]  ;;  %v282_v27 = vld [vmem:[%s2168_s29 + $0x318] sm:$0xff]  ;;  %v299_v31 = vld [vmem:[%s2168_s29 + $0x3a0] sm:$0xff] }
  0x25   :  { %1240 = vmatpush3.bf16.msra.mxu0 %v317_v36  ;;  %454 = vmatprep.mubr.bf16.mxu1 %v178_v1  ;;  %v359_v20 = vpack.c.bf16 %v280_v5, %v279_v4  ;;  %v352_v21 = vpack.c.bf16 %v266_v10, %v265_v9  ;;  %v156_v24 = vcombine.high %v1792_v15, %v1792_v15  ;;  %v300_v32 = vld [vmem:[%s2168_s29 + $0x3a8] sm:$0xff]  ;;  %v283_v40 = vld [vmem:[%s2168_s29 + $0x320] sm:$0xff]  ;;  %v269_v44 = vld [vmem:[%s2168_s29 + $0x2b0] sm:$0xff] }
  0x26   :  { %1262 = vmatpush3.bf16.msra.mxu1 %v333_v37  ;;  %1241 = vmatprep.subr.bf16.mxu0 %v326_v38  ;;  %v113_v25 = vcombine.high %v1795_v16, %v1795_v16  ;;  %v368_v26 = vpack.c.bf16 %v298_v12, %v297_v11  ;;  %v157_v30 = vcombine.high %v1798_v17, %v1798_v17  ;;  %v251_v38 = vld [vmem:[%s2168_s29 + $0x220] sm:$0xff]  ;;  %v252_v39 = vld [vmem:[%s2168_s29 + $0x228] sm:$0xff]  ;;  %v270_v45 = vld [vmem:[%s2168_s29 + $0x2b8] sm:$0xff] }
  0x27   :  { %1263 = vmatprep.subr.bf16.mxu1 %v342_v49  ;;  %414 = vmatprep.mubr.bf16.mxu0 %v176_v6  ;;  %v172_v33 = vsel %vm166_vm0, %v112_v14, %v156_v24  ;;  %v344_v34 = vpack.c.bf16 %v250_v23, %v249_v22  ;;  %v360_v36 = vpack.c.bf16 %v282_v27, %v281_v13  ;;  %v284_v43 = vld [vmem:[%s2168_s29 + $0x328] sm:$0xff]  ;;  %v301_v47 = vld [vmem:[%s2168_s29 + $0x3b0] sm:$0xff]  ;;  %v302_v48 = vld [vmem:[%s2168_s29 + $0x3b8] sm:$0xff] }
  0x28   :  { %v180_v35 = vpack.c.bf16 %v172_v33, %v172_v33  ;;  %v353_v37 = vpack.c.bf16 %v268_v29, %v267_v28  ;;  %v174_v41 = vsel %vm166_vm0, %v113_v25, %v157_v30  ;;  %v369_v42 = vpack.c.bf16 %v300_v32, %v299_v31  ;;  %v253_v52 = vld [vmem:[%s2168_s29 + $0x230] sm:$0xff]  ;;  %v254_v53 = vld [vmem:[%s2168_s29 + $0x238] sm:$0xff]  ;;  %v303_v60 = vld [vmem:[%s2168_s29 + $0x3c0] sm:$0xff] }
  0x29   :  { %1242 = vmatpush3.bf16.msra.mxu0 %v318_v58  ;;  %v182_v46 = vpack.c.bf16 %v174_v41, %v174_v41  ;;  %v345_v49 = vpack.c.bf16 %v252_v39, %v251_v38  ;;  %v361_v50 = vpack.c.bf16 %v284_v43, %v283_v40  ;;  %v354_v51 = vpack.c.bf16 %v270_v45, %v269_v44  ;;  %v285_v54 = vld [vmem:[%s2168_s29 + $0x330] sm:$0xff]  ;;  %v286_v57 = vld [vmem:[%s2168_s29 + $0x338] sm:$0xff]  ;;  %v271_v58 = vld [vmem:[%s2168_s29 + $0x2c0] sm:$0xff] }
  0x2a   :  { %1264 = vmatpush3.bf16.msra.mxu1 %v334_v59  ;;  %1271 = vmatprep.subr.bf16.mxu0 %v351_v61  ;;  %v370_v55 = vpack.c.bf16 %v302_v48, %v301_v47  ;;  %v272_v59 = vld [vmem:[%s2168_s29 + $0x2c8] sm:$0xff]  ;;  %v346_v62 = vpack.c.bf16 %v254_v53, %v253_v52  ;;  %v362_v63 = vpack.c.bf16 %v286_v57, %v285_v54  ;;  %v255_v2 = vld [vmem:[%s2168_s29 + $0x240] sm:$0xff]  ;;  %v305_v9 = vld [vmem:[%s2168_s29 + $0x3d0] sm:$0xff]  ;;  %v1413_v53 = vmov 0.0|0.0  }
  0x2b   :  { %1293 = vmatprep.subr.bf16.mxu1 %v367_v8  ;;  %v304_v61 = vld [vmem:[%s2168_s29 + $0x3c8] sm:$0xff]  ;;  %v355_v1 = vpack.c.bf16 %v272_v59, %v271_v58  ;;  %v287_v4 = vld [vmem:[%s2168_s29 + $0x340] sm:$0xff]  ;;  %v274_v8 = vld [vmem:[%s2168_s29 + $0x2d8] sm:$0xff]  ;;  %v171_v47 = vsel %vm166_vm0, %v1760_v56, %v1792_v15 }
  0x2c   :  { %415 = vmatmul.mubr.bf16.vlgmr.msra.gmra.mrb[0].mxu0 %v175_v7  ;;  %v256_v3 = vld [vmem:[%s2168_s29 + $0x248] sm:$0xff]  ;;  %v371_v5 = vpack.c.bf16 %v304_v61, %v303_v60  ;;  %v273_v7 = vld [vmem:[%s2168_s29 + $0x2d0] sm:$0xff]  ;;  %v306_v10 = vld [vmem:[%s2168_s29 + $0x3d8] sm:$0xff] }
  0x2d   :  { %455 = vmatmul.mubr.bf16.vlgmr.msra.gmra.mrb[0].mxu1 %v177_v18  ;;  %1272 = vmatpush3.bf16.msra.mxu0 %v343_v19  ;;  %v288_v6 = vld [vmem:[%s2168_s29 + $0x348] sm:$0xff]  ;;  %v347_v11 = vpack.c.bf16 %v256_v3, %v255_v2  ;;  %v356_v14 = vpack.c.bf16 %v274_v8, %v273_v7  ;;  %v257_v18 = vld [vmem:[%s2168_s29 + $0x250] sm:$0xff]  ;;  %v258_v19 = vld [vmem:[%s2168_s29 + $0x258] sm:$0xff] }
  0x2e   :  { %1294 = vmatpush3.bf16.msra.mxu1 %v359_v20  ;;  %1273 = vmatprep.subr.bf16.mxu0 %v352_v21  ;;  %v363_v12 = vpack.c.bf16 %v288_v6, %v287_v4  ;;  %v289_v20 = vld [vmem:[%s2168_s29 + $0x350] sm:$0xff]  ;;  %v372_v21 = vpack.c.bf16 %v306_v10, %v305_v9  ;;  %v290_v22 = vld [vmem:[%s2168_s29 + $0x358] sm:$0xff]  ;;  %v275_v23 = vld [vmem:[%s2168_s29 + $0x2e0] sm:$0xff] }
  0x2f   :  { %1295 = vmatprep.subr.bf16.mxu1 %v368_v26  ;;  %494 = vmatprep.mubr.bf16.mxu0 %v180_v35  ;;  %v276_v13 = vld [vmem:[%s2168_s29 + $0x2e8] sm:$0xff]  ;;  %v307_v24 = vld [vmem:[%s2168_s29 + $0x3e0] sm:$0xff]  ;;  %v348_v26 = vpack.c.bf16 %v258_v19, %v257_v18  ;;  %v364_v27 = vpack.c.bf16 %v290_v22, %v289_v20  ;;  %v278_v35 = vld [vmem:[%s2168_s29 + $0x2f8] sm:$0xff] }
  0x30   :  { %534 = vmatprep.mubr.bf16.mxu1 %v182_v46  ;;  %v308_v25 = vld [vmem:[%s2168_s29 + $0x3e8] sm:$0xff]  ;;  %v357_v28 = vpack.c.bf16 %v276_v13, %v275_v23  ;;  %v259_v29 = vld [vmem:[%s2168_s29 + $0x260] sm:$0xff]  ;;  %v261_v41 = vld [vmem:[%s2168_s29 + $0x270] sm:$0xff] }
  0x31   :  { %1274 = vmatpush3.bf16.msra.mxu0 %v344_v34  ;;  %v260_v30 = vld [vmem:[%s2168_s29 + $0x268] sm:$0xff]  ;;  %v291_v31 = vld [vmem:[%s2168_s29 + $0x360] sm:$0xff]  ;;  %v373_v32 = vpack.c.bf16 %v308_v25, %v307_v24  ;;  %v277_v34 = vld [vmem:[%s2168_s29 + $0x2f0] sm:$0xff] }
  0x32   :  { %1296 = vmatpush3.bf16.msra.mxu1 %v360_v36  ;;  %1275 = vmatprep.subr.bf16.mxu0 %v353_v37  ;;  %v292_v33 = vld [vmem:[%s2168_s29 + $0x368] sm:$0xff]  ;;  %v309_v36 = vld [vmem:[%s2168_s29 + $0x3f0] sm:$0xff]  ;;  %v310_v37 = vld [vmem:[%s2168_s29 + $0x3f8] sm:$0xff]  ;;  %v349_v38 = vpack.c.bf16 %v260_v30, %v259_v29  ;;  %v358_v40 = vpack.c.bf16 %v278_v35, %v277_v34 }
  0x33   :  { %1297 = vmatprep.subr.bf16.mxu1 %v369_v42  ;;  %v365_v39 = vpack.c.bf16 %v292_v33, %v291_v31  ;;  %v262_v42 = vld [vmem:[%s2168_s29 + $0x278] sm:$0xff]  ;;  %v374_v43 = vpack.c.bf16 %v310_v37, %v309_v36  ;;  %v293_v44 = vld [vmem:[%s2168_s29 + $0x370] sm:$0xff]  ;;  %v543_v52 = vld [vmem:[%s2171_s30] sm:$0xff] }
  0x34   :  { %v294_v45 = vld [vmem:[%s2168_s29 + $0x378] sm:$0xff]  ;;  %v350_v46 = vpack.c.bf16 %v262_v42, %v261_v41  ;;  %v544_v56 = vld [vmem:[%s2171_s30 + $0x8] sm:$0xff]  ;;  %v1207_v59 = vld [vmem:[%s2172_s0] ss:$0 sm:$0xff] }
  0x35   :  { %1276 = vmatpush3.bf16.msra.mxu0 %v345_v49  ;;  %v366_v48 = vpack.c.bf16 %v294_v45, %v293_v44  ;;  %v173_v49 = vsel %vm166_vm0, %v1795_v16, %v1798_v17  ;;  %v1375_v15 = vpack.c.bf16 %v544_v56, %v543_v52  ;;  %v545_v16 = vld [vmem:[%s2171_s30 + $0x10] sm:$0xff]  ;;  %v546_v17 = vld [vmem:[%s2171_s30 + $0x18] sm:$0xff]  ;;  %v699_v13 = vld [vmem:[%s2173_s4] sm:$0xff] }
  0x36   :  { %1298 = vmatpush3.bf16.msra.mxu1 %v361_v50  ;;  %1277 = vmatprep.subr.bf16.mxu0 %v354_v51  ;;  %v179_v50 = vpack.c.bf16 %v171_v47, %v171_v47  ;;  %v181_v51 = vpack.c.bf16 %v173_v49, %v173_v49  ;;  %v1378_v54 = vpack.c.bf16 %v546_v17, %v545_v16  ;;  %v700_v24 = vld [vmem:[%s2173_s4 + $0x8] sm:$0xff]  ;;  %v1208_v30 = vld [vmem:[%s2139_s5] ss:$0 sm:$0xff] }
  0x37   :  { %1299 = vmatprep.subr.bf16.mxu1 %v370_v55  ;;  %v1415_v55 = vmov 0.0   ;;  %v1381_v25 = vpack.c.bf16 %v700_v24, %v699_v13  ;;  %v1212_v13 = vld [vmem:[%s2141_s7] ss:$0 sm:$0xff] }
  0x38   :  { %v2017_v29 = vsel %vm630_vm3, 1.0, %v1415_v55 }
  0x39   :  { %1278 = vmatpush3.bf16.msra.mxu0 %v346_v62  ;;  %v2023_v31 = vsub.f32 1.0, %v2017_v29 }
  0x3a   :  { %1300 = vmatpush3.bf16.msra.mxu1 %v362_v63  ;;  %1279 = vmatprep.subr.bf16.mxu0 %v355_v1 }
  0x3b   :  { %1301 = vmatprep.subr.bf16.mxu1 %v371_v5 }
  0x3d   :  { %1280 = vmatpush3.bf16.msra.mxu0 %v347_v11 }
  0x3e   :  { %1302 = vmatpush3.bf16.msra.mxu1 %v363_v12  ;;  %1281 = vmatprep.subr.bf16.mxu0 %v356_v14 }
  0x3f   :  { %1303 = vmatprep.subr.bf16.mxu1 %v372_v21 }
  0x41   :  { %1282 = vmatpush3.bf16.msra.mxu0 %v348_v26  ;;  %v782_v26 = vld [vmem:[%s2174_s3] sm:$0xff] }
  0x42   :  { %1304 = vmatpush3.bf16.msra.mxu1 %v364_v27  ;;  %1283 = vmatprep.subr.bf16.mxu0 %v357_v28  ;;  %v783_v27 = vld [vmem:[%s2174_s3 + $0x8] sm:$0xff] }
  0x43   :  { %1305 = vmatprep.subr.bf16.mxu1 %v373_v32  ;;  %v1384_v28 = vpack.c.bf16 %v783_v27, %v782_v26  ;;  %v1011_v27 = vld [vmem:[%s2142_s16] sm:$0xff] }
  0x45   :  { %1284 = vmatpush3.bf16.msra.mxu0 %v349_v38 }
  0x46   :  { %1306 = vmatpush3.bf16.msra.mxu1 %v365_v39  ;;  %1285 = vmatprep.subr.bf16.mxu0 %v358_v40 }
  0x47   :  { %1307 = vmatprep.subr.bf16.mxu1 %v374_v43 }
  0x49   :  { %1286 = vmatpush3.bf16.msra.mxu0 %v350_v46 }
  0x4a   :  { %1308 = vmatpush3.bf16.msra.mxu1 %v366_v48  ;;  %1383 = vmatprep.subr.bf16.mxu0 %v1413_v53 }
  0x4b   :  { %1374 = vmatprep.subr.bf16.mxu1 %v1413_v53 }
  0x4c   :  { %495 = vmatmul.mubr.bf16.vlgmr.msra.gmra.mrb[4].mxu0 %v179_v50 }
  0x4d   :  { %535 = vmatmul.mubr.bf16.vlgmr.msra.gmra.mrb[4].mxu1 %v181_v51  ;;  %1355 = vmatprep.mubr.msk.f32.mxu0 %vm1414_vm1, %v1415_v55 }
  0x4e   :  { %1376 = vmatpush3.bf16.msra.mxu1 %v1375_v15  ;;  %1341 = vmatprep.mubr.msk.f32.mxu1 %vm1414_vm1, %v1415_v55 }
  0x4f   :  { %1377 = vmatprep.subr.bf16.mxu1 %v1413_v53  ;;  %1385 = vmatpush3.bf16.msra.mxu0 %v1384_v28  ;;  %v1012_v28 = vld [vmem:[%s2142_s16 + $0x8] sm:$0xff] }
  0x50   :  { %1386 = vmatprep.subr.bf16.mxu0 %v1413_v53 }
  0x52   :  { %1379 = vmatpush3.bf16.msra.mxu1 %v1378_v54 }
  0x53   :  { %1380 = vmatprep.subr.bf16.mxu1 %v1413_v53 }
  0xff   :  { %v1243_v57 = vpop.f32.mrb[0].mxu0 }
 0x100   :  { %v1265_v58 = vpop.f32.mrb[0].mxu1  ;;  %v1244_v60 = vpop.f32.mrb[1].mxu0 }
 0x101   :  { %v1245_v61 = vadd.f32 %v1244_v60, %v1243_v57  ;;  %v1266_v62 = vpop.f32.mrb[1].mxu1  ;;  %v1246_v63 = vpop.f32.mrb[2].mxu0 }
 0x102   :  { %v1267_v1 = vadd.f32 %v1266_v62, %v1265_v58  ;;  %v1268_v2 = vpop.f32.mrb[2].mxu1  ;;  %v1247_v3 = vpop.f32.mrb[3].mxu0 }
 0x103   :  { %v417_v4 = vadd.f32 %v1245_v61, %v1207_v59  ;;  %v1269_v5 = vpop.f32.mrb[3].mxu1 }
 0x105   :  { %v457_v6 = vadd.f32 %v1267_v1, %v417_v4 }
 0x11f   :  { %v1287_v7 = vpop.f32.mrb[4].mxu0 }
 0x120   :  { %v1309_v8 = vpop.f32.mrb[4].mxu1  ;;  %v1288_v9 = vpop.f32.mrb[5].mxu0 }
 0x121   :  { %v1289_v10 = vadd.f32 %v1288_v9, %v1287_v7  ;;  %v1310_v11 = vpop.f32.mrb[5].mxu1  ;;  %v1290_v12 = vpop.f32.mrb[6].mxu0 }
 0x122   :  { %v1311_v14 = vadd.f32 %v1310_v11, %v1309_v8  ;;  %v1312_v18 = vpop.f32.mrb[6].mxu1  ;;  %v1291_v19 = vpop.f32.mrb[7].mxu0 }
 0x123   :  { %v497_v20 = vadd.f32 %v1289_v10, %v457_v6  ;;  %v1313_v21 = vpop.f32.mrb[7].mxu1 }
 0x125   :  { %v1993_v22 = vadd.f32 %v1311_v14, %v497_v20  ;;  %v1211_v20 = vld [vmem:[%s2140_s6] ss:$0 sm:$0xff] }
 0x127   :  { %v542_v23 = vmax.f32 %v1993_v22, 0.0 }
 0x129   :  { %1342 = vmatmul.mubr.msk.f32.vlgmr.msra.gmra.mrb[8].mxu1 %vm554_vm2, %v542_v23 }
 0x12a   :  { %1348 = vmatprep.mubr.msk.f32.mxu1 %vm1414_vm1, %v1415_v55  ;;  %1382 = vmatpush3.bf16.msra.mxu1 %v1381_v25 }
 0x12b   :  { %1358 = vmatprep.subr.mxu1 %v1415_v55 }
 0x1fc   :  { %v624_v32 = vpop.f32.mrb[8].mxu1 }
 0x1fd   :  { %v625_v33 = vadd.f32 %v1208_v30, %v624_v32  ;;  %v1343_v34 = vpop.f32.mrb[9].mxu1  ;;  %v1213_v30 = vld [vmem:[%s2143_s9] ss:$0 sm:$0xff] }
 0x1ff   :  { %v634_v35 = vmul.f32 %v2017_v29, %v625_v33  ;;  %v644_v36 = vmul.f32 %v2023_v31, %v625_v33 }
 0x201   :  { %v636_v0 = vsel %vm635_vm4, %v634_v35, 0.0  ;;  %v645_v37 = vsel %vm635_vm4, %v644_v36, 0.0  ;;  %v1013_v36 = vld [vmem:[%s2142_s16 + $0x10] sm:$0xff] }
 0x202   :  { %v637_v38 = vrot.slane %v636_v0, 4  ;;  %v646_v39 = vrot.slane %v645_v37, 4 }
 0x204   :  { %v638_v40 = vadd.f32 %v637_v38, %v636_v0  ;;  %v647_v41 = vadd.f32 %v646_v39, %v645_v37  ;;  %v1014_v0 = vld [vmem:[%s2142_s16 + $0x18] sm:$0xff]  ;;  %v929_v38 = vld [vmem:[%s2144_s14] sm:$0xff]  ;;  %v27_v39 = vstv %s2145_s21 }
 0x205   :  { %v1390_v37 = vpack.c.bf16 %v1014_v0, %v1013_v36  ;;  %28 = vst [vmem:[#allocation2] sm:$0x1] %v27_v39 }
 0x206   :  { %v639_v42 = vrot.slane %v638_v40, 2  ;;  %v648_v43 = vrot.slane %v647_v41, 2 }
 0x208   :  { %v640_v44 = vadd.f32 %v639_v42, %v638_v40  ;;  %v649_v45 = vadd.f32 %v648_v43, %v647_v41 }
 0x20a   :  { %v641_v46 = vrot.slane %v640_v44, 1  ;;  %v650_v47 = vrot.slane %v649_v45, 1 }
 0x20c   :  { %v642_v48 = vadd.f32 %v641_v46, %v640_v44  ;;  %v651_v49 = vadd.f32 %v650_v47, %v649_v45  ;;  %v1221_v46 = vld [vmem:[%s2147_s17] ss:$0 sm:$0xff] }
 0x20e   :  { %v643_v50 = vmul.f32 0.5, %v642_v48  ;;  %v652_v51 = vmul.f32 0.5, %v651_v49 }
 0x210   :  { %v653_v52 = vmul.f32 %v2017_v29, %v643_v50  ;;  %v654_v56 = vmul.f32 %v652_v51, %v2023_v31 }
 0x212   :  { %v655_v15 = vadd.f32 %v654_v56, %v653_v52 }
 0x214   :  { %v656_v16 = vsub.f32 %v625_v33, %v655_v15  ;;  %v1387_v33 = vpack.c.bf16 %v1012_v28, %v1011_v27 }
 0x216   :  { %v657_v17 = vmul.f32 %v656_v16, %v656_v16 }
 0x218   :  { %v658_v54 = vmul.f32 %v2017_v29, %v657_v17  ;;  %v667_v57 = vmul.f32 %v657_v17, %v2023_v31 }
 0x21a   :  { %v659_v58 = vsel %vm635_vm4, %v658_v54, 0.0  ;;  %v668_v59 = vsel %vm635_vm4, %v667_v57, 0.0 }
 0x21b   :  { %v660_v60 = vrot.slane %v659_v58, 4  ;;  %v669_v61 = vrot.slane %v668_v59, 4 }
 0x21d   :  { %v661_v62 = vadd.f32 %v660_v60, %v659_v58  ;;  %v670_v63 = vadd.f32 %v669_v61, %v668_v59 }
 0x21f   :  { %v662_v1 = vrot.slane %v661_v62, 2  ;;  %v671_v2 = vrot.slane %v670_v63, 2 }
 0x221   :  { %v663_v3 = vadd.f32 %v662_v1, %v661_v62  ;;  %v672_v4 = vadd.f32 %v671_v2, %v670_v63 }
 0x223   :  { %v664_v5 = vrot.slane %v663_v3, 1  ;;  %v673_v6 = vrot.slane %v672_v4, 1 }
 0x225   :  { %v665_v7 = vadd.f32 %v664_v5, %v663_v3  ;;  %v674_v8 = vadd.f32 %v673_v6, %v672_v4 }
 0x227   :  { %v666_v9 = vmul.f32 0.5, %v665_v7  ;;  %v675_v10 = vmul.f32 0.5, %v674_v8 }
 0x229   :  { %v676_v11 = vmul.f32 %v2017_v29, %v666_v9  ;;  %v677_v12 = vmul.f32 %v675_v10, %v2023_v31 }
 0x22b   :  { %v678_v14 = vadd.f32 %v677_v12, %v676_v11 }
 0x22d   :  { %v679_v18 = vadd.f32 1e-05, %v678_v14 }
 0x22f   :  { %1402 = vrsqrt.f32 %v679_v18 }
 0x239   :  { %v1403_v19 = vpop.eup %1402 }
 0x23a   :  { %v681_v21 = vmul.f32 %v1403_v19, %v656_v16 }
 0x23c   :  { %v689_v24 = vmul.f32 %v1211_v20, %v681_v21 }
 0x23e   :  { %v697_v25 = vadd.f32 %v1212_v13, %v689_v24 }
 0x240   :  { %v698_v26 = vmax.f32 %v697_v25, 0.0 }
 0x242   :  { %1349 = vmatmul.mubr.msk.f32.vlgmr.msra.gmra.mrb[10].mxu1 %vm708_vm5, %v698_v26 }
 0x243   :  { %1360 = vmatprep.mubr.msk.f32.mxu1 %vm1414_vm1, %v1415_v55  ;;  %1359 = vmatpush3.msra.mxu1 %v929_v38 }
 0x315   :  { %v778_v32 = vpop.f32.mrb[10].mxu1 }
 0x316   :  { %v2055_v34 = vadd.f32 %v1213_v30, %v778_v32  ;;  %v1350_v35 = vpop.f32.mrb[11].mxu1 }
 0x318   :  { %1356 = vmatmul.mubr.msk.f32.vlgmr.msra.gmra.mrb[8].mxu0 %vm708_vm5, %v2055_v34 }
 0x319   :  { %1388 = vmatpush3.bf16.msra.mxu0 %v1387_v33  ;;  %1371 = vmatprep.mubr.msk.f32.mxu0 %vm1414_vm1, %v1415_v55  ;;  %v1215_v55 = vld [vmem:[%s2146_s11] ss:$0 sm:$0xff] }
 0x31a   :  { %1389 = vmatprep.subr.bf16.mxu0 %v1413_v53 }
 0x31d   :  { %1391 = vmatpush3.bf16.msra.mxu0 %v1390_v37 }
 0x320   :  { %1372 = vmatmul.mubr.msk.f32.vlgmr.msra.gmra.mrb[10].mxu0 %vm554_vm2, %v542_v23 }
 0x3eb   :  { %v860_v53 = vpop.f32.mrb[8].mxu0 }
 0x3ec   :  { %v861_v40 = vadd.f32 %v1215_v55, %v860_v53  ;;  %v1357_v41 = vpop.f32.mrb[9].mxu0 }
 0x3ee   :  { %v864_v22 = vmul.f32 %v2017_v29, %v861_v40  ;;  %v874_v23 = vmul.f32 %v861_v40, %v2023_v31 }
 0x3f0   :  { %v866_v42 = vsel %vm865_vm6, %v864_v22, 0.0  ;;  %v875_v43 = vsel %vm865_vm6, %v874_v23, 0.0 }
 0x3f1   :  { %v867_v44 = vrot.slane %v866_v42, 4  ;;  %v876_v45 = vrot.slane %v875_v43, 4 }
 0x3f3   :  { %v868_v47 = vadd.f32 %v867_v44, %v866_v42  ;;  %v877_v48 = vadd.f32 %v876_v45, %v875_v43  ;;  %v1088_v49 = vpop.f32.mrb[10].mxu0 }
 0x3f4   :  { %v1089_v50 = vadd.f32 %v1221_v46, %v1088_v49  ;;  %v1373_v51 = vpop.f32.mrb[11].mxu0 }
 0x3f5   :  { %v869_v52 = vrot.slane %v868_v47, 2  ;;  %v878_v56 = vrot.slane %v877_v48, 2 }
 0x3f6   :  { %v1092_v15 = vmul.f32 %v2017_v29, %v1089_v50  ;;  %v1101_v16 = vmul.f32 %v1089_v50, %v2023_v31 }
 0x3f7   :  { %v870_v17 = vadd.f32 %v869_v52, %v868_v47  ;;  %v879_v54 = vadd.f32 %v878_v56, %v877_v48 }
 0x3f8   :  { %v1093_v57 = vsel %vm635_vm4, %v1092_v15, 0.0  ;;  %v1102_v58 = vsel %vm635_vm4, %v1101_v16, 0.0 }
 0x3f9   :  { %v871_v59 = vrot.slane %v870_v17, 1  ;;  %v880_v60 = vrot.slane %v879_v54, 1  ;;  %v1094_v61 = vrot.slane %v1093_v57, 4  ;;  %v1103_v62 = vrot.slane %v1102_v58, 4 }
 0x3fb   :  { %v872_v63 = vadd.f32 %v871_v59, %v870_v17  ;;  %v881_v1 = vadd.f32 %v880_v60, %v879_v54  ;;  %v1095_v2 = vadd.f32 %v1094_v61, %v1093_v57  ;;  %v1104_v3 = vadd.f32 %v1103_v62, %v1102_v58 }
 0x3fd   :  { %v873_v4 = vmul.f32 0.5, %v872_v63  ;;  %v882_v5 = vmul.f32 0.5, %v881_v1  ;;  %v1096_v6 = vrot.slane %v1095_v2, 2  ;;  %v1105_v7 = vrot.slane %v1104_v3, 2 }
 0x3ff   :  { %v883_v8 = vmul.f32 %v2017_v29, %v873_v4  ;;  %v884_v9 = vmul.f32 %v882_v5, %v2023_v31  ;;  %v1097_v10 = vadd.f32 %v1096_v6, %v1095_v2  ;;  %v1106_v11 = vadd.f32 %v1105_v7, %v1104_v3 }
 0x401   :  { %v885_v12 = vadd.f32 %v884_v9, %v883_v8  ;;  %v1098_v14 = vrot.slane %v1097_v10, 1  ;;  %v1107_v18 = vrot.slane %v1106_v11, 1 }
 0x403   :  { %v886_v19 = vsub.f32 %v861_v40, %v885_v12  ;;  %v1099_v20 = vadd.f32 %v1098_v14, %v1097_v10  ;;  %v1108_v21 = vadd.f32 %v1107_v18, %v1106_v11  ;;  %v1217_v10 = vld [vmem:[%s2148_s12] ss:$0 sm:$0xff] }
 0x404   :  { %v1218_v12 = vld [vmem:[%s2149_s13] ss:$0 sm:$0xff]  ;;  %s1416_s13 = smov 32  }
 0x405   :  { %v887_v13 = vmul.f32 %v886_v19, %v886_v19  ;;  %v1100_v24 = vmul.f32 0.5, %v1099_v20  ;;  %v1109_v25 = vmul.f32 0.5, %v1108_v21 }
 0x407   :  { %v888_v26 = vmul.f32 %v2017_v29, %v887_v13  ;;  %v897_v27 = vmul.f32 %v887_v13, %v2023_v31  ;;  %v1110_v28 = vmul.f32 %v2017_v29, %v1100_v24  ;;  %v1111_v30 = vmul.f32 %v1109_v25, %v2023_v31  ;;  %v1224_v13 = vld [vmem:[%s2151_s19] ss:$0 sm:$0xff] }
 0x408   :  { %v1225_v25 = vld [vmem:[%s2152_s20] ss:$0 sm:$0xff]  ;;  %s1417_s20 = smov 16  }
 0x409   :  { %v889_v32 = vsel %vm865_vm6, %v888_v26, 0.0  ;;  %v898_v33 = vsel %vm865_vm6, %v897_v27, 0.0  ;;  %v1112_v35 = vadd.f32 %v1111_v30, %v1110_v28  ;;  %v1226_v30 = vld [vmem:[#allocation2] ss:$0 sm:$0xff] }
 0x40a   :  { %v890_v36 = vrot.slane %v889_v32, 4  ;;  %v899_v0 = vrot.slane %v898_v33, 4 }
 0x40b   :  { %v1113_v37 = vsub.f32 %v1089_v50, %v1112_v35 }
 0x40c   :  { %v891_v38 = vadd.f32 %v890_v36, %v889_v32  ;;  %v900_v39 = vadd.f32 %v899_v0, %v898_v33 }
 0x40d   :  { %v1114_v55 = vmul.f32 %v1113_v37, %v1113_v37 }
 0x40e   :  { %v892_v53 = vrot.slane %v891_v38, 2  ;;  %v901_v40 = vrot.slane %v900_v39, 2 }
 0x40f   :  { %v1115_v41 = vmul.f32 %v2017_v29, %v1114_v55  ;;  %v1124_v22 = vmul.f32 %v1114_v55, %v2023_v31 }
 0x410   :  { %v893_v23 = vadd.f32 %v892_v53, %v891_v38  ;;  %v902_v42 = vadd.f32 %v901_v40, %v900_v39 }
 0x411   :  { %v1116_v43 = vsel %vm635_vm4, %v1115_v41, 0.0  ;;  %v1125_v44 = vsel %vm635_vm4, %v1124_v22, 0.0 }
 0x412   :  { %v894_v45 = vrot.slane %v893_v23, 1  ;;  %v903_v46 = vrot.slane %v902_v42, 1  ;;  %v1117_v47 = vrot.slane %v1116_v43, 4  ;;  %v1126_v48 = vrot.slane %v1125_v44, 4 }
 0x414   :  { %v895_v49 = vadd.f32 %v894_v45, %v893_v23  ;;  %v904_v50 = vadd.f32 %v903_v46, %v902_v42  ;;  %v1118_v51 = vadd.f32 %v1117_v47, %v1116_v43  ;;  %v1127_v52 = vadd.f32 %v1126_v48, %v1125_v44  ;;  %v1219_v43 = vld [vmem:[%s2153_s15] ss:$0 sm:$0xff] }
 0x416   :  { %v896_v56 = vmul.f32 0.5, %v895_v49  ;;  %v905_v15 = vmul.f32 0.5, %v904_v50  ;;  %v1119_v16 = vrot.slane %v1118_v51, 2  ;;  %v1128_v17 = vrot.slane %v1127_v52, 2 }
 0x418   :  { %v906_v54 = vmul.f32 %v2017_v29, %v896_v56  ;;  %v907_v57 = vmul.f32 %v905_v15, %v2023_v31  ;;  %v1120_v58 = vadd.f32 %v1119_v16, %v1118_v51  ;;  %v1129_v59 = vadd.f32 %v1128_v17, %v1127_v52 }
 0x41a   :  { %v908_v60 = vadd.f32 %v907_v57, %v906_v54  ;;  %v1121_v61 = vrot.slane %v1120_v58, 1  ;;  %v1130_v62 = vrot.slane %v1129_v59, 1 }
 0x41c   :  { %v909_v63 = vadd.f32 1e-05, %v908_v60  ;;  %v1122_v1 = vadd.f32 %v1121_v61, %v1120_v58  ;;  %v1131_v2 = vadd.f32 %v1130_v62, %v1129_v59 }
 0x41e   :  { %1404 = vrsqrt.f32 %v909_v63  ;;  %v1123_v3 = vmul.f32 0.5, %v1122_v1  ;;  %v1132_v4 = vmul.f32 0.5, %v1131_v2 }
 0x420   :  { %v1133_v5 = vmul.f32 %v2017_v29, %v1123_v3  ;;  %v1134_v6 = vmul.f32 %v1132_v4, %v2023_v31  ;;  %v1223_v31 = vld [vmem:[%s2150_s18] ss:$0 sm:$0xff] }
 0x422   :  { %v1135_v7 = vadd.f32 %v1134_v6, %v1133_v5 }
 0x424   :  { %v1136_v8 = vadd.f32 1e-05, %v1135_v7 }
 0x426   :  { %1406 = vrsqrt.f32 %v1136_v8 }
 0x428   :  { %v1405_v9 = vpop.eup %1404 }
 0x429   :  { %v911_v11 = vmul.f32 %v1405_v9, %v886_v19 }
 0x42b   :  { %v919_v14 = vmul.f32 %v1217_v10, %v911_v11 }
 0x42d   :  { %v927_v18 = vadd.f32 %v1218_v12, %v919_v14 }
 0x42f   :  { %v928_v20 = vmax.f32 %v927_v18, 0.0 }
 0x430   :  { %v1407_v29 = vpop.eup %1406 }
 0x431   :  { %v1138_v21 = vmul.f32 %v1407_v29, %v1113_v37  ;;  %1361 = vmatmul.mubr.msk.f32.vlgmr.msra.gmra.mrb[12].mxu1 %vm937_vm7, %v928_v20 }
 0x433   :  { %v1146_v19 = vmul.f32 %v1223_v31, %v1138_v21 }
 0x435   :  { %v1154_v24 = vadd.f32 %v1224_v13, %v1146_v19 }
 0x437   :  { %v1155_v26 = vmax.f32 %v1154_v24, 0.0 }
 0x439   :  { %v1163_v27 = vmul.f32 %v1225_v25, %v1155_v26 }
 0x43b   :  { %v1164_v28 = vsel %vm635_vm4, %v1163_v27, 0.0 }
 0x43c   :  { %1165 = vadd.xlane.f32.xlu0 %v1164_v28 }
 0x4c9   :  { %v1166_v32 = vpop.xlane.xlu0 %1165 }
 0x4ca   :  { %v1174_v33 = vadd.f32 %v1226_v30, %v1166_v32 }
 0x4cc   :  { %v1176_v35 = vmin.f32 %v1174_v33, 20.0  ;;  %vm1175_vm9 = vcmp.gt.f32.partialorder %v1174_v33, 20.0 }
 0x4ce   :  { %v1177_v36 = vmul.f32 1.442695, %v1176_v35 }
 0x4d0   :  { %1408 = vpow2.f32 %v1177_v36 }
 0x4da   :  { %v1409_v0 = vpop.eup %1408 }
 0x4db   :  { %v1179_v37 = vadd.f32 1.0, %v1409_v0  ;;  %v1182_v38 = vmul.f32 -0.5, %v1409_v0  ;;  %v1185_v55 = vand.u32 2147483647, %v1409_v0 }
 0x4dd   :  { %1410 = vlog2.f32 %v1179_v37  ;;  %v1183_v39 = vadd.f32 1.0, %v1182_v38  ;;  %vm1186_vm8 = vcmp.lt.f32.partialorder %v1185_v55, 0.0004427343 }
 0x4df   :  { %v1184_v41 = vmul.f32 %v1409_v0, %v1183_v39 }
 0x4e7   :  { %v1411_v53 = vpop.eup %1410 }
 0x4e8   :  { %v1181_v40 = vmul.f32 0.6931472, %v1411_v53 }
 0x4ea   :  { %v1187_v22 = vsel %vm1186_vm8, %v1184_v41, %v1181_v40 }
 0x4eb   :  { %v1188_v23 = vsel %vm1175_vm9, %v1174_v33, %v1187_v22 }
 0x4ec   :  { %v1189_v42 = vadd.f32 1e-06, %v1188_v23 }
 0x4ee   :  { %1195 = vrot.lane.b32.xlu1 %v1189_v42, %s1416_s13 }
 0x504   :  { %v1007_v44 = vpop.f32.mrb[12].mxu1 }
 0x505   :  { %v1008_v45 = vadd.f32 %v1219_v43, %v1007_v44  ;;  %v1362_v46 = vpop.f32.mrb[13].mxu1 }
 0x507   :  { %1191 = vrot.lane.b32.xlu0 %v1008_v45, %s1417_s20 }
 0x560   :  { %v1196_v48 = vpop.permute.xlu1 %1195 }
 0x579   :  { %v1192_v47 = vpop.permute.xlu0 %1191 }
 0x57a   :  { %v1198_v49 = vsel %vm708_vm5, %v2055_v34, %v1192_v47 }
 0x57b   :  { %v1199_v50 = vsel %vm554_vm2, %v1198_v49, %v1196_v48 }
 0x57c   :  { %v1201_v51 = vsel %vm1200_vm10, %v1199_v50, 0.0 }
 0x57d   :  { %1202 = vst [vmem:[%s2154_s22] sm:$0xf] %v1201_v51 }

</bundles_post_ra>
